<compile_context>
chip_gen: v5e
topology: v5e:2x2
jax: 0.10.0
libtpu: 0.0.40
codegen_flags: <defaults>
</compile_context>

<pallas_src>
import functools

import jax
import jax.numpy as jnp
from jax.experimental import pallas as pl
from jax.experimental.pallas import tpu as pltpu

LATENT_DIM = 2
HIDDEN = 200
OUT_DIM = 19795
TILE_N = 3328  # lane-dense (26 * 128); 19795 pads to 19968 = 6 * 3328


def _decoder_kernel(z_ref, w1_ref, b1_ref, w2_ref, b2_ref, o_ref):
    # ---- Layer 1 (recomputed per tile; tiny, resident inputs) ----
    h = jnp.dot(z_ref[...], w1_ref[...], preferred_element_type=jnp.float32)
    h = h + b1_ref[...]
    # Numerically stable softplus: max(x,0) + log1p(exp(-|x|)) == F.softplus.
    h = jnp.maximum(h, 0.0) + jnp.log1p(jnp.exp(-jnp.abs(h)))

    # ---- Layer 2: one contiguous lane-dense W2 tile ----
    # Keep h in f32 and upcast the (possibly bf16) weight tile: the kernel is
    # HBM-bound, so f32 LHS precision is free (weight-only quantization).
    w2_tile = w2_ref[0].astype(jnp.float32)          # (H, TILE_N)
    out = jnp.dot(h, w2_tile, preferred_element_type=jnp.float32)
    o_ref[...] = (out + b2_ref[...]).astype(o_ref.dtype)


def prepare_params(w1, b1, w2, b2, w2_dtype=jnp.bfloat16):
    """One-time parameter packing (init time, NOT per forward call):
      * pad W2 / b2 along the output-feature dim to a multiple of TILE_N
        (19795 -> 19968, +0.9% traffic),
      * pre-tile W2 to (n_tiles, HIDDEN, TILE_N) so each grid step's W2 DMA is
        a single contiguous block,
      * reshape biases to (1, features) 2-D VMEM tiles,
      * store W2 in bf16 by default (halves HBM traffic of the bandwidth-bound
        stream; f32 accumulation preserved).  Use w2_dtype=jnp.float32 for the
        bit-exact path."""
    h_dim, n = w2.shape
    n_tiles = pl.cdiv(n, TILE_N)
    n_pad = n_tiles * TILE_N

    w1_f = jnp.asarray(w1, jnp.float32)
    b1_2d = jnp.asarray(b1, jnp.float32).reshape(1, -1)

    w2_p = jnp.pad(jnp.asarray(w2, jnp.float32), ((0, 0), (0, n_pad - n)))
    # (H, n_pad) -> (n_tiles, H, TILE_N): contiguous per-tile layout in HBM.
    w2_t = jnp.transpose(w2_p.reshape(h_dim, n_tiles, TILE_N), (1, 0, 2))
    w2_t = w2_t.astype(w2_dtype)

    b2_p = jnp.pad(jnp.asarray(b2, jnp.float32).reshape(1, n), ((0, 0), (0, n_pad - n)))
    return (w1_f, b1_2d, w2_t, b2_p, n)


@functools.partial(jax.jit, static_argnames=("n_out",))
def _decoder_forward_packed(z, w1, b1_2d, w2_t, b2_p, *, n_out):
    B, L = z.shape
    H = w1.shape[1]
    n_tiles, _, tile_n = w2_t.shape
    n_pad = n_tiles * tile_n

    cost = pl.CostEstimate(
        flops=2 * B * H * n_pad + n_tiles * 2 * B * L * H,
        transcendentals=2 * n_tiles * B * H,
        bytes_accessed=int(w2_t.size * w2_t.dtype.itemsize
                           + b2_p.size * 4 + B * n_pad * 4
                           + n_tiles * (z.size + w1.size + b1_2d.size) * 4),
    )

    out_padded = pl.pallas_call(
        _decoder_kernel,
        out_shape=jax.ShapeDtypeStruct((B, n_pad), jnp.float32),
        grid_spec=pltpu.PrefetchScalarGridSpec(
            num_scalar_prefetch=0,
            grid=(n_tiles,),
            in_specs=[
                pl.BlockSpec((B, L), lambda j: (0, 0)),           # z   (resident)
                pl.BlockSpec((L, H), lambda j: (0, 0)),           # W1  (resident)
                pl.BlockSpec((1, H), lambda j: (0, 0)),           # b1  (resident)
                pl.BlockSpec((1, H, tile_n), lambda j: (j, 0, 0)),  # W2 tile (streamed)
                pl.BlockSpec((1, tile_n), lambda j: (0, j)),      # b2 tile
            ],
            out_specs=pl.BlockSpec((B, tile_n), lambda j: (0, j)),
        ),
        compiler_params=pltpu.CompilerParams(
            dimension_semantics=("parallel",),
        ),
        cost_estimate=cost,
    )(z, w1, b1_2d, w2_t, b2_p)

    return out_padded[:, :n_out]


def decoder_forward(z, packed_params):
    w1, b1_2d, w2_t, b2_p, n_out = packed_params
    return _decoder_forward_packed(z, w1, b1_2d, w2_t, b2_p, n_out=n_out)


def init_params(key, latent_dim=LATENT_DIM, hidden=HIDDEN, out_dim=OUT_DIM):
    k1, k2, k3, k4 = jax.random.split(key, 4)
    # Deterministic synthetic init (roughly nn.Linear-like scaling).
    w1 = jax.random.normal(k1, (latent_dim, hidden), jnp.float32) * (1.0 / jnp.sqrt(latent_dim))
    b1 = jax.random.normal(k2, (hidden,), jnp.float32) * 0.01
    w2 = jax.random.normal(k3, (hidden, out_dim), jnp.float32) * (1.0 / jnp.sqrt(hidden))
    b2 = jax.random.normal(k4, (out_dim,), jnp.float32) * 0.01
    return w1, b1, w2, b2


def reference_forward(z, w1, b1, w2, b2):
    h = jax.nn.softplus(z @ w1 + b1)
    return h @ w2 + b2


if __name__ == "__main__":
    key = jax.random.PRNGKey(0)
    kz, kp = jax.random.split(key)

    B = 2
    z = jax.random.normal(kz, (B, LATENT_DIM), jnp.float32)
    w1, b1, w2, b2 = init_params(kp)

    # Default (production) path: bf16-streamed W2, f32 activations + accumulation.
    packed_bf16 = prepare_params(w1, b1, w2, b2)  # w2_dtype=bf16 by default
    out_bf16 = jax.block_until_ready(decoder_forward(z, packed_bf16))
    ref_bf16 = reference_forward(z, w1, b1, w2.astype(jnp.bfloat16).astype(jnp.float32), b2)
    assert out_bf16.shape == (B, OUT_DIM), out_bf16.shape
    assert jnp.allclose(out_bf16, ref_bf16, atol=1e-3, rtol=1e-3), float(
        jnp.max(jnp.abs(out_bf16 - ref_bf16)))

    # Bit-exact f32-weight path (matches the PyTorch module semantics).
    packed_f32 = prepare_params(w1, b1, w2, b2, w2_dtype=jnp.float32)
    out_f32 = jax.block_until_ready(decoder_forward(z, packed_f32))
    ref = reference_forward(z, w1, b1, w2, b2)
    assert out_f32.shape == (B, OUT_DIM), out_f32.shape
    assert jnp.allclose(out_f32, ref, atol=1e-4, rtol=1e-4), float(
        jnp.max(jnp.abs(out_f32 - ref)))

    # TODO(synk): optional int8 (v5e/v6e) / fp8-e4m3 (v7x) W2 with per-column
    # scales would cut HBM traffic another 2x; needs accuracy validation.
    print("KERNEL_OK")
</pallas_src>

<mosaic_0001>
module attributes {stable_mosaic.version = 11 : i64} {
  func.func @_decoder_kernel(%arg0: i32, %arg1: memref<2x2xf32, #tpu.memory_space<vmem>>, %arg2: memref<2x200xf32, #tpu.memory_space<vmem>>, %arg3: memref<1x200xf32, #tpu.memory_space<vmem>>, %arg4: memref<1x200x3328xbf16, #tpu.memory_space<vmem>>, %arg5: memref<1x3328xf32, #tpu.memory_space<vmem>>, %arg6: memref<2x3328xf32, #tpu.memory_space<vmem>>) attributes {dimension_semantics = [#tpu.dimension_semantics<parallel>], iteration_bounds = array<i64: 6>, scalar_prefetch = 0 : i64, scratch_operands = 0 : i64, tpu.core_type = #tpu.core_type<tc>, window_params = [{pipeline_mode = #tpu.pipeline_mode<synchronous>, transform_indices = @transform_0, window_bounds = array<i64: 2, 2>}, {pipeline_mode = #tpu.pipeline_mode<synchronous>, transform_indices = @transform_1, window_bounds = array<i64: 2, 200>}, {pipeline_mode = #tpu.pipeline_mode<synchronous>, transform_indices = @transform_2, window_bounds = array<i64: 1, 200>}, {transform_indices = @transform_3, window_bounds = array<i64: 1, 200, 3328>}, {transform_indices = @transform_4, window_bounds = array<i64: 1, 3328>}, {transform_indices = @transform_5, window_bounds = array<i64: 2, 3328>}]} {
    %c0 = arith.constant 0 : index
    %c0_0 = arith.constant 0 : index
    %0 = vector.load %arg1[%c0, %c0_0] : memref<2x2xf32, #tpu.memory_space<vmem>>, vector<2x2xf32>
    %c0_1 = arith.constant 0 : index
    %c0_2 = arith.constant 0 : index
    %1 = vector.load %arg2[%c0_1, %c0_2] : memref<2x200xf32, #tpu.memory_space<vmem>>, vector<2x200xf32>
    %cst = arith.constant dense<0.000000e+00> : vector<2x200xf32>
    %2 = tpu.matmul %0, %1, %cst {dimension_numbers = #tpu.dot_dimension_numbers<[1], [0], [0], [1], [0, 0, 1, 1], [], []>} : vector<2x2xf32>, vector<2x200xf32>, vector<2x200xf32> -> vector<2x200xf32>
    %c0_3 = arith.constant 0 : index
    %c0_4 = arith.constant 0 : index
    %3 = vector.load %arg3[%c0_3, %c0_4] : memref<1x200xf32, #tpu.memory_space<vmem>>, vector<1x200xf32>
    %4 = vector.broadcast %3 : vector<1x200xf32> to vector<2x200xf32>
    %5 = arith.addf %2, %4 : vector<2x200xf32>
    %cst_5 = arith.constant 0.000000e+00 : f32
    %6 = vector.broadcast %cst_5 : f32 to vector<2x200xf32>
    %7 = arith.maximumf %5, %6 : vector<2x200xf32>
    %8 = math.absf %5 : vector<2x200xf32>
    %cst_6 = arith.constant 0.000000e+00 : f32
    %9 = vector.broadcast %cst_6 : f32 to vector<2x200xf32>
    %10 = arith.subf %9, %8 : vector<2x200xf32>
    %11 = math.exp %10 : vector<2x200xf32>
    %12 = math.log1p %11 : vector<2x200xf32>
    %13 = arith.addf %7, %12 : vector<2x200xf32>
    %c0_7 = arith.constant 0 : index
    %c0_8 = arith.constant 0 : index
    %c0_9 = arith.constant 0 : index
    %14 = vector.load %arg4[%c0_7, %c0_8, %c0_9] : memref<1x200x3328xbf16, #tpu.memory_space<vmem>>, vector<1x200x3328xbf16>
    %15 = vector.shape_cast %14 : vector<1x200x3328xbf16> to vector<200x3328xbf16>
    %16 = arith.extf %15 : vector<200x3328xbf16> to vector<200x3328xf32>
    %cst_10 = arith.constant dense<0.000000e+00> : vector<2x3328xf32>
    %17 = tpu.matmul %13, %16, %cst_10 {dimension_numbers = #tpu.dot_dimension_numbers<[1], [0], [0], [1], [0, 0, 1, 1], [], []>} : vector<2x200xf32>, vector<200x3328xf32>, vector<2x3328xf32> -> vector<2x3328xf32>
    %c0_11 = arith.constant 0 : index
    %c0_12 = arith.constant 0 : index
    %18 = vector.load %arg5[%c0_11, %c0_12] : memref<1x3328xf32, #tpu.memory_space<vmem>>, vector<1x3328xf32>
    %19 = vector.broadcast %18 : vector<1x3328xf32> to vector<2x3328xf32>
    %20 = arith.addf %17, %19 : vector<2x3328xf32>
    %c0_13 = arith.constant 0 : index
    %c0_14 = arith.constant 0 : index
    %21 = vector.load %arg6[%c0_13, %c0_14] : memref<2x3328xf32, #tpu.memory_space<vmem>>, vector<2x3328xf32>
    tpu.vector_store %arg6[%c0_13, %c0_14], %20 {strides = array<i32>} : memref<2x3328xf32, #tpu.memory_space<vmem>>, vector<2x3328xf32>,
    return
  }
  func.func @transform_0(%arg0: i32) -> (i32, i32) {
    %c0_i32 = arith.constant 0 : i32
    %c0_i32_0 = arith.constant 0 : i32
    %c0_i32_1 = arith.constant 0 : i32
    return %c0_i32, %c0_i32_0 : i32, i32
  }
  func.func @transform_1(%arg0: i32) -> (i32, i32) {
    %c0_i32 = arith.constant 0 : i32
    %c0_i32_0 = arith.constant 0 : i32
    %c0_i32_1 = arith.constant 0 : i32
    return %c0_i32, %c0_i32_0 : i32, i32
  }
  func.func @transform_2(%arg0: i32) -> (i32, i32) {
    %c0_i32 = arith.constant 0 : i32
    %c0_i32_0 = arith.constant 0 : i32
    %c0_i32_1 = arith.constant 0 : i32
    return %c0_i32, %c0_i32_0 : i32, i32
  }
  func.func @transform_3(%arg0: i32) -> (i32, i32, i32) {
    %c0_i32 = arith.constant 0 : i32
    %c0_i32_0 = arith.constant 0 : i32
    %c0_i32_1 = arith.constant 0 : i32
    return %arg0, %c0_i32, %c0_i32_0 : i32, i32, i32
  }
  func.func @transform_4(%arg0: i32) -> (i32, i32) {
    %c0_i32 = arith.constant 0 : i32
    %c0_i32_0 = arith.constant 0 : i32
    return %c0_i32, %arg0 : i32, i32
  }
  func.func @transform_5(%arg0: i32) -> (i32, i32) {
    %c0_i32 = arith.constant 0 : i32
    %c0_i32_0 = arith.constant 0 : i32
    return %c0_i32, %arg0 : i32, i32
  }
}

</mosaic_0001>

<bundles_post_ra>
// kernel: _decoder_forward_packed.1
= control target key start
LH: loop header
LB: loop body
LE: loop exit
PB: predicated region body
PF: predicated region fallthrough
CT: control target
= control target key end

     0   :  { %s4813_s0 = inlined_call_operand.hbm [shape: f32[2,2], index: 0, kind: input, shape index: {}]   ;;  %s4814_s1 = inlined_call_operand.hbm [shape: f32[2,200], index: 1, kind: input, shape index: {}]   ;;  %s4815_s2 = inlined_call_operand.hbm [shape: f32[1,200], index: 2, kind: input, shape index: {}]   ;;  %s4816_s3 = inlined_call_operand.hbm [shape: bf16[6,200,3328], index: 3, kind: input, shape index: {}]   ;;  %s4817_s4 = inlined_call_operand.hbm [shape: f32[1,19968], index: 4, kind: input, shape index: {}]   ;;  %s4818_s5 = inlined_call_operand.vmem [shape: f32[2,19968], index: 5, kind: output, shape index: {}]  }
   0x1   :  { %4820 = sst [smem:[#allocation13_spill]] %s4814_s1 }
   0x2   :  { %10 = vsyncpa [#allocation3], 0 }
   0x3   :  { %11 = vsyncpa [#allocation5], 0 }
   0x4   :  { %12 = vsyncpa [#allocation8], 0 }
   0x5   :  { %14 = vsyncpa [#allocation8 + $0x1], 0  ;;  %s3061_s18 = smov 0   ;;  %s3063_s19 = smov 0  }
   0x6   :  { %s3065_s20 = smov 0   ;;  %s3067_s21 = smov 0  }
   0x7 LB: > { %s3080_s22 = sadd.s32 4294967295, %s3024_s21   ;;  %p103_p0 = scmp.ne.s32.totalorder %s3016_s19, %s3012_s18  ;;  %s3024_s21 = sphi %s3067_s21, %s4831_s21   ;;  %s3020_s20 = sphi %s3065_s20, %s4830_s20   ;;  %s3016_s19 = sphi %s3063_s19, %s4829_s19   ;;  %s3012_s18 = sphi %s3061_s18, %s4828_s18  }
   0x8   : > { %p104_p1 = scmp.eq.s32.totalorder %s3080_s22, 0  ;;  %p2699_p2 = scmp.ge.s32.totalorder %s3024_s21, 1 }
   0x9   : > { %p166_p3 = scmp.lt.s32.totalorder %s3024_s21, 7  ;;  %s4822_s1 = sld [smem:[#allocation13_spill]] }
   0xa   : > { %p3088_p4 = por %p104_p1, %p103_p0  ;;  %s3026_s28 = smov [#allocation4]  }
   0xb   : > { %p3095_p5 = pnand %p2699_p2, %p166_p3  ;;  %s192_s29 = sshll.u32 %s3026_s28, 4  ;;  %s193_s29 = int_to_ptr.vmem [resolvable:$true] %s192_s29 }
   0xc   : > { %s3108_s6 = sadd.s32 1, %s3024_s21   ;;  %s90_s7 = sadd.s32 1, %s3020_s20 }
   0xd   : > { %p2763_p6 = pneg %p3095_p5  ;;  %s87_s8 = ssub.s32 %s3024_s21, %s3108_s6 }
   0xe   : > { %p88_p8 = scmp.eq.s32.totalorder %s87_s8, 0  ;;  %p97_p9 = scmp.ne.s32.totalorder %s3020_s20, %s3016_s19 }
   0xf   : > { %s190_s26 = sshll.u32 %s4822_s1, 4  ;;  %p3103_p7 = pnand %p2763_p6, %p104_p1  ;;  %s191_s26 = int_to_ptr.hbm [resolvable:$true] %s190_s26 }
  0x10   : > { %p98_p10 = scmp.eq.s32.totalorder %s3024_s21, 0  ;;  %p2783_p11 = scmp.lt.s32.totalorder %s3024_s21, 6 }
  0x11   : > { %2769 = dma.hbm_to_vmem [thread:$0]  (!%p3103_p7), %s191_s26, 64, %s193_s29, [#allocation5]  }
  0x12   : > { %s3120_s9 = scalar_select %p88_p8, %s3020_s20, %s90_s7  }
  0x13   : > { %p99_p12 = por %p98_p10, %p97_p9  ;;  %s215_s10 = sand.u32 1, %s3024_s21  }
  0x14   : > { %s4819_s11 = sand.u32 1, %s3020_s20   ;;  %s2743_s14 = smul.u32 2600, %s3024_s21 }
  0x15   : > { %s2742_s12 = smul.u32 2600, %s4819_s11  ;;  %p3126_p13 = pnand %p2783_p11, %p99_p12 }
  0x16   : > { %s224_s17 = scalar_lea.hbm %s4816_s3, %s2743_s14  ;;  %s3134_s26 = scalar_lea.sflag [#allocation8], %s215_s10 }
  0x17   : > { %s219_s18 = scalar_lea.vmem [#allocation7], %s2742_s12  ;;  %s225_s25 = sshll.u32 %s224_s17, 4  ;;  %s226_s25 = int_to_ptr.hbm [resolvable:$true] %s225_s25 }
  0x18   : > { %s227_s24 = sshll.u32 %s219_s18, 4  ;;  %s2862_s28 = sshra.s32 %s226_s25, 4  ;;  %s228_s24 = int_to_ptr.vmem [resolvable:$true] %s227_s24  ;;  %s2863_s28 = int_to_ptr.hbm [resolvable:$true] %s2862_s28 }
  0x19   : > { %s2864_s29 = scalar_lea.hbm %s2863_s28, 2600  ;;  %p2866_p2 = pneg %p3126_p13 }
  0x1a   : > { %p2865_p0 = scmp.ne.s32.totalorder %s2863_s28, %s2864_s29  ;;  %s2869_s12 = scalar_lea.hbm %s4816_s3, 15600 }
  0x1b   : > { %p2870_p8 = scmp.lt.s32.totalorder %s2863_s28, %s4816_s3  ;;  %p2871_p9 = scmp.lt.s32.totalorder %s2869_s12, %s2864_s29 }
  0x1c   : > { %p2867_p3 = pnand %p2866_p2, %p2865_p0 }
  0x1d   : > { %p2872_p10 = por %p2871_p9, %p2870_p8 }
  0x1e   : > { %p2868_p6 = pneg %p2867_p3 }
  0x20   : > { %p2873_p11 = pnand %p2872_p10, %p2868_p6 }
  0x22   : > { %2876 = shalt.err (!%p2873_p11)
}
  0x23   : > { %s3027_s10 = smov 1664   ;;  %s3028_s16 = smov 104  }
  0x24   : > { %2776 = dma.hbm_to_vmem [thread:$0]  (!%p3126_p13), %s226_s25, 41600, %s228_s24, %s3134_s26, %s3027_s10, %s3027_s10, %s3028_s16  }
  0x25   : > { %s178_s7 = sshll.u32 %s4813_s0, 4  ;;  %s3029_s28 = smov [#allocation2]   ;;  %s179_s7 = int_to_ptr.hbm [resolvable:$true] %s178_s7 }
  0x26   : > { %s180_s29 = sshll.u32 %s3029_s28, 4  ;;  %s202_s14 = sshll.u32 %s4815_s2, 4  ;;  %s181_s29 = int_to_ptr.vmem [resolvable:$true] %s180_s29  ;;  %s203_s14 = int_to_ptr.hbm [resolvable:$true] %s202_s14 }
  0x27   : > { %2766 = dma.hbm_to_vmem [thread:$0]  (!%p3103_p7), %s179_s7, 32, %s181_s29, [#allocation3]  }
  0x28   : > { %s3030_s15 = smov [#allocation6]   ;;  %s4826_s1 = sand.u32 1, %s3020_s20  }
  0x29   : > { %s204_s11 = sshll.u32 %s3030_s15, 4  ;;  %s2744_s24 = smul.u32 26, %s4826_s1  ;;  %s205_s11 = int_to_ptr.vmem [resolvable:$true] %s204_s11 }
  0x2a   : > { %s242_s25 = smul.u32 26, %s3024_s21  ;;  %s2959_s30 = scalar_lea.hbm %s4817_s4, 156 }
  0x2b   : > { %2772 = dma.hbm_to_vmem [thread:$0]  (!%p3103_p7), %s203_s14, 32, %s205_s11, [#allocation5]  }
  0x2c   : > { %s245_s17 = scalar_lea.hbm %s4817_s4, %s242_s25  ;;  %s241_s28 = scalar_lea.vmem [#allocation9], %s2744_s24 }
  0x2d   : > { %s247_s18 = sshll.u32 %s245_s17, 4  ;;  %s249_s8 = sshll.u32 %s241_s28, 4  ;;  %s248_s18 = int_to_ptr.hbm [resolvable:$true] %s247_s18  ;;  %s250_s8 = int_to_ptr.vmem [resolvable:$true] %s249_s8 }
  0x2e   : > { %s2952_s7 = sshra.s32 %s248_s18, 4  ;;  %s2953_s7 = int_to_ptr.hbm [resolvable:$true] %s2952_s7 }
  0x2f   : > { %s2954_s29 = scalar_lea.hbm %s2953_s7, 26  ;;  %p2960_p7 = scmp.lt.s32.totalorder %s2953_s7, %s4817_s4 }
  0x30   : > { %p2955_p12 = scmp.ne.s32.totalorder %s2953_s7, %s2954_s29  ;;  %p2961_p6 = scmp.lt.s32.totalorder %s2959_s30, %s2954_s29 }
  0x32   : > { %p2957_p0 = pnand %p2955_p12, %p2866_p2  ;;  %p2962_p8 = por %p2961_p6, %p2960_p7 }
  0x34   : > { %p2958_p3 = pneg %p2957_p0 }
  0x36   : > { %p2963_p9 = pnand %p2962_p8, %p2958_p3 }
  0x38   : > { %2966 = shalt.err (!%p2963_p9)
}
  0x39   : > { %2779 = dma.hbm_to_vmem [thread:$0]  (!%p3126_p13), %s248_s18, 416, %s250_s8, %s3134_s26  }
  0x3a   : > { %258 = sbr.rel (%p3095_p5) target bundleno = 681 (0x2a9), region = 40 }
  0x3f   : > { %2999 = dma.done.wait (%p104_p1), [#allocation3], 32  }
  0x40   : > { %3001 = vsyncadd (%p104_p1), [#allocation3], 4294967264 }
  0x41   : > { %3003 = dma.done.wait (%p104_p1), [#allocation5], 96  }
  0x42   : > { %3005 = vsyncadd (%p104_p1), [#allocation5], 4294967200  ;;  %s275_s13 = sand.u32 1, %s3080_s22   ;;  %s277_s26 = sand.u32 1, %s3016_s19  }
  0x43   : > { %s2745_s27 = smul.u32 2600, %s277_s26  ;;  %s276_s14 = scalar_lea.sflag [#allocation8], %s275_s13 }
  0x45   : > { %s3192_s15 = scalar_lea.vmem [#allocation7], %s2745_s27 }
  0x46   : > { %3007 = dma.done.wait (%p3088_p4), %s276_s14, 42016  }
  0x47   : > { %3009 = vsyncadd (%p3088_p4), %s276_s14, 4294925280  ;;  %v330_v0 = vld [vmem:[#allocation4] sm:$0xf]  ;;  %v589_v4 = vld [vmem:[%s3192_s15 + $0x548] sm:$0xff]  ;;  %vm345_vm0 = vcmask 1041408   ;;  %vm341_vm1 = vcmask 15360  }
  0x48   : > { %v615_v1 = vld [vmem:[%s3192_s15 + $0x618] sm:$0xff]  ;;  %338 = vst [vmem:[#allocation1] ss:$4 sm:$0xff] %v330_v0  ;;  %v602_v3 = vld [vmem:[%s3192_s15 + $0x5b0] sm:$0xff]  ;;  %v1083_v8 = vunpack.c.l.bf16 %v589_v4  ;;  %v1084_v9 = vunpack.c.h.bf16 %v589_v4  ;;  %v576_v10 = vld [vmem:[%s3192_s15 + $0x4e0] sm:$0xff]  ;;  %vm1455_vm3 = vcmask 588800  }
  0x49   : > { %v1135_v2 = vunpack.c.l.bf16 %v615_v1  ;;  %v1136_v5 = vunpack.c.h.bf16 %v615_v1  ;;  %v1109_v6 = vunpack.c.l.bf16 %v602_v3  ;;  %v1110_v7 = vunpack.c.h.bf16 %v602_v3  ;;  %v732_v11 = vld [vmem:[%s3192_s15 + $0x9c0] sm:$0xff]  ;;  %v563_v12 = vld [vmem:[%s3192_s15 + $0x478] sm:$0xff]  ;;  %v550_v17 = vld [vmem:[%s3192_s15 + $0x410] sm:$0xff]  ;;  %s3975_s23 = smul.u32 26, %s277_s26 }
  0x4a   : > { %v719_v13 = vld [vmem:[%s3192_s15 + $0x958] sm:$0xff]  ;;  %v1057_v15 = vunpack.c.l.bf16 %v576_v10  ;;  %v1369_v16 = vunpack.c.l.bf16 %v732_v11  ;;  %v3207_v18 = vld [vmem:[%s3192_s15 + $0x8f0] sm:$0xff]  ;;  %v1058_v21 = vunpack.c.h.bf16 %v576_v10  ;;  %v1370_v22 = vunpack.c.h.bf16 %v732_v11  ;;  %v3214_v25 = vld [vmem:[%s3192_s15 + $0x3a8] sm:$0xff]  ;;  %s323_s25 = smul.u32 26, %s3080_s22 }
  0x4b   : > { %1459 = vmatpush.msra.mxu2 %v1135_v2  ;;  %1499 = vmatpush.msra.mxu0 %v1136_v5  ;;  %v329_v14 = vld [vmem:[#allocation2] sm:$0x3]  ;;  %v1031_v23 = vunpack.c.l.bf16 %v563_v12  ;;  %v1343_v24 = vunpack.c.l.bf16 %v719_v13  ;;  %v3217_v26 = vld [vmem:[%s3192_s15 + $0x888] sm:$0xff]  ;;  %v1032_v27 = vunpack.c.h.bf16 %v563_v12  ;;  %v1344_v28 = vunpack.c.h.bf16 %v719_v13  ;;  %v3221_v31 = vld [vmem:[%s3192_s15 + $0x340] sm:$0xff]  ;;  %s4018_s24 = scalar_lea.vmem [#allocation9], %s3975_s23 }
  0x4c   : > { %v1005_v29 = vunpack.c.l.bf16 %v550_v17  ;;  %v1317_v30 = vunpack.c.l.bf16 %v3207_v18  ;;  %v3224_v32 = vld [vmem:[%s3192_s15 + $0x820] sm:$0xff]  ;;  %v1006_v33 = vunpack.c.h.bf16 %v550_v17  ;;  %v979_v34 = vunpack.c.l.bf16 %v3214_v25  ;;  %v3229_v36 = vld [vmem:[%s3192_s15 + $0x2d8] sm:$0xff]  ;;  %v3237_v40 = vld [vmem:[%s3192_s15 + $0x270] sm:$0xff]  ;;  %p4053_p1 = scmp.lt.s32.totalorder %s323_s25, 155 }
  0x4d   : > { %1460 = vmatpush.msra.mxu2 %v1109_v6  ;;  %1500 = vmatpush.msra.mxu0 %v1110_v7  ;;  %v1291_v35 = vunpack.c.l.bf16 %v3217_v26  ;;  %v3232_v37 = vld [vmem:[%s3192_s15 + $0x7b8] sm:$0xff]  ;;  %v953_v38 = vunpack.c.l.bf16 %v3221_v31  ;;  %v1265_v39 = vunpack.c.l.bf16 %v3224_v32  ;;  %v3240_v41 = vld [vmem:[%s3192_s15 + $0x750] sm:$0xff]  ;;  %v927_v42 = vunpack.c.l.bf16 %v3229_v36  ;;  %v3245_v44 = vld [vmem:[%s3192_s15 + $0x208] sm:$0xff] }
  0x4e   : > { %v1239_v43 = vunpack.c.l.bf16 %v3232_v37  ;;  %v3248_v45 = vld [vmem:[%s3192_s15 + $0x6e8] sm:$0xff]  ;;  %v901_v46 = vunpack.c.l.bf16 %v3237_v40  ;;  %v1213_v47 = vunpack.c.l.bf16 %v3240_v41  ;;  %v3253_v48 = vld [vmem:[%s3192_s15 + $0x1a0] sm:$0xff]  ;;  %v875_v50 = vunpack.c.l.bf16 %v3245_v44  ;;  %v3262_v53 = vld [vmem:[%s3192_s15 + $0x138] sm:$0xff]  ;;  %s4833_s25 = smov (!%p4053_p1, %s323_s25), 155 }
  0x4f   : > { %1461 = vmatpush.msra.mxu2 %v1083_v8  ;;  %1501 = vmatpush.msra.mxu0 %v1084_v9  ;;  %v339_v19 = vld.sshfl [vmem:[#allocation1] sm:$0xff pattern:$0x73625140]  ;;  %v340_v20 = vld.sshfl [vmem:[#allocation1 + $0x8] sm:$0xff pattern:$0x73625140]  ;;  %v1187_v51 = vunpack.c.l.bf16 %v3248_v45  ;;  %v849_v54 = vunpack.c.l.bf16 %v3253_v48  ;;  %v823_v57 = vunpack.c.l.bf16 %v3262_v53  ;;  %v980_v60 = vunpack.c.h.bf16 %v3214_v25 }
  0x50   : > { %2710 = vmatpush.msk.msra.mxu3 %vm345_vm0, %v339_v19  ;;  %2712 = vmatpush.msk.msra.mxu1 %vm345_vm0, %v340_v20  ;;  %v3256_v49 = vld [vmem:[%s3192_s15 + $0x680] sm:$0xff]  ;;  %v3268_v58 = vld [vmem:[%s3192_s15 + $0xd0] sm:$0xff]  ;;  %v1318_v61 = vunpack.c.h.bf16 %v3207_v18  ;;  %v603_v62 = vld [vmem:[%s3192_s15 + $0x5b8] sm:$0xff]  ;;  %v954_v2 = vunpack.c.h.bf16 %v3221_v31  ;;  %v1292_v3 = vunpack.c.h.bf16 %v3217_v26  ;;  %v928_v8 = vunpack.c.h.bf16 %v3229_v36  ;;  %s2709_s22 = sshll.u32 %s4833_s25, 1 }
  0x51   : > { %2711 = vmatmul.msk.f32.vlgmr.msra.gmra.mxu3 %vm341_vm1, %v329_v14  ;;  %2713 = vmatmul.msk.f32.vlgmr.msra.gmra.mxu1 %vm341_vm1, %v329_v14  ;;  %v616_v52 = vld [vmem:[%s3192_s15 + $0x620] sm:$0xff]  ;;  %v1161_v55 = vunpack.c.l.bf16 %v3256_v49  ;;  %v797_v59 = vunpack.c.l.bf16 %v3268_v58  ;;  %v1111_v63 = vunpack.c.l.bf16 %v603_v62  ;;  %v3275_v0 = vld [vmem:[%s3192_s15 + $0x68] sm:$0xff]  ;;  %v590_v4 = vld [vmem:[%s3192_s15 + $0x550] sm:$0xff]  ;;  %v1266_v9 = vunpack.c.h.bf16 %v3224_v32  ;;  %s4123_s18 = scalar_lea.vmem %s4818_s5, %s2709_s22 }
  0x52   : > { %1462 = vmatpush.msra.mxu2 %v1057_v15  ;;  %1486 = vmatpush.msrb.mxu3 %v1369_v16  ;;  %v1137_v56 = vunpack.c.l.bf16 %v616_v52  ;;  %v771_v1 = vunpack.c.l.bf16 %v3275_v0  ;;  %v1085_v5 = vunpack.c.l.bf16 %v590_v4  ;;  %v3282_v6 = vld [vmem:[%s3192_s15] sm:$0xff]  ;;  %v577_v10 = vld [vmem:[%s3192_s15 + $0x4e8] sm:$0xff]  ;;  %v1138_v12 = vunpack.c.h.bf16 %v616_v52  ;;  %v551_v20 = vld [vmem:[%s3192_s15 + $0x418] sm:$0xff] }
  0x53   : > { %1502 = vmatpush.msra.mxu0 %v1058_v21  ;;  %1526 = vmatpush.msrb.mxu1 %v1370_v22  ;;  %v745_v7 = vunpack.c.l.bf16 %v3282_v6  ;;  %v1059_v11 = vunpack.c.l.bf16 %v577_v10  ;;  %v902_v13 = vunpack.c.h.bf16 %v3237_v40  ;;  %v1240_v14 = vunpack.c.h.bf16 %v3232_v37  ;;  %v564_v15 = vld [vmem:[%s3192_s15 + $0x480] sm:$0xff]  ;;  %v538_v25 = vld [vmem:[%s3192_s15 + $0x3b0] sm:$0xff]  ;;  %v733_v31 = vld [vmem:[%s3192_s15 + $0x9c8] sm:$0xff] }
  0x54   : > { %1463 = vmatpush.msra.mxu2 %v1031_v23  ;;  %1487 = vmatpush.msrb.mxu3 %v1343_v24  ;;  %v1033_v16 = vunpack.c.l.bf16 %v564_v15  ;;  %v1112_v17 = vunpack.c.h.bf16 %v603_v62  ;;  %v876_v18 = vunpack.c.h.bf16 %v3245_v44  ;;  %v1214_v19 = vunpack.c.h.bf16 %v3240_v41  ;;  %v512_v36 = vld [vmem:[%s3192_s15 + $0x2e0] sm:$0xff] }
  0x55   : > { %1503 = vmatpush.msra.mxu0 %v1032_v27  ;;  %1527 = vmatpush.msrb.mxu1 %v1344_v28  ;;  %v1007_v21 = vunpack.c.l.bf16 %v551_v20  ;;  %v1086_v22 = vunpack.c.h.bf16 %v590_v4  ;;  %v850_v23 = vunpack.c.h.bf16 %v3253_v48  ;;  %v1188_v24 = vunpack.c.h.bf16 %v3248_v45  ;;  %v720_v37 = vld [vmem:[%s3192_s15 + $0x960] sm:$0xff]  ;;  %v486_v48 = vld [vmem:[%s3192_s15 + $0x210] sm:$0xff] }
  0x56   : > { %1464 = vmatpush.msra.mxu2 %v1005_v29  ;;  %1488 = vmatpush.msrb.mxu3 %v1317_v30  ;;  %v981_v26 = vunpack.c.l.bf16 %v538_v25  ;;  %v1060_v27 = vunpack.c.h.bf16 %v577_v10  ;;  %v824_v28 = vunpack.c.h.bf16 %v3262_v53  ;;  %v1162_v29 = vunpack.c.h.bf16 %v3256_v49  ;;  %v525_v30 = vld [vmem:[%s3192_s15 + $0x348] sm:$0xff]  ;;  %v694_v49 = vld [vmem:[%s3192_s15 + $0x890] sm:$0xff] }
  0x57   : > { %1504 = vmatpush.msra.mxu0 %v1006_v33  ;;  %1528 = vmatpush.msrb.mxu1 %v1318_v61  ;;  %v955_v32 = vunpack.c.l.bf16 %v525_v30  ;;  %v1371_v33 = vunpack.c.l.bf16 %v733_v31  ;;  %v1008_v40 = vunpack.c.h.bf16 %v551_v20  ;;  %v772_v41 = vunpack.c.h.bf16 %v3275_v0  ;;  %v668_v61 = vld [vmem:[%s3192_s15 + $0x7c0] sm:$0xff] }
  0x58   : > { %1465 = vmatpush.msra.mxu2 %v979_v34  ;;  %1489 = vmatpush.msrb.mxu3 %v1291_v35  ;;  %v1034_v34 = vunpack.c.h.bf16 %v564_v15  ;;  %v798_v35 = vunpack.c.h.bf16 %v3268_v58  ;;  %v956_v52 = vunpack.c.h.bf16 %v525_v30  ;;  %v1372_v53 = vunpack.c.h.bf16 %v733_v31  ;;  %v421_v15 = vld [vmem:[%s3192_s15 + $0x8] sm:$0xff] }
  0x59   : > { %1505 = vmatpush.msra.mxu0 %v980_v60  ;;  %1529 = vmatpush.msrb.mxu1 %v1292_v3  ;;  %v930_v58 = vunpack.c.h.bf16 %v512_v36  ;;  %v460_v60 = vld [vmem:[%s3192_s15 + $0x140] sm:$0xff]  ;;  %v655_v3 = vld [vmem:[%s3192_s15 + $0x758] sm:$0xff]  ;;  %v1242_v20 = vunpack.c.h.bf16 %v668_v61  ;;  %vm2545_vm5 = vcmask 1045508   ;;  %vm2547_vm6 = vcmask 1043456  }
  0x5a   : > { %1466 = vmatpush.msra.mxu2 %v953_v38  ;;  %1490 = vmatpush.msrb.mxu3 %v1265_v39  ;;  %v929_v38 = vunpack.c.l.bf16 %v512_v36  ;;  %v1345_v39 = vunpack.c.l.bf16 %v720_v37  ;;  %v825_v62 = vunpack.c.l.bf16 %v460_v60 }
  0x5b   : > { %1506 = vmatpush.msra.mxu0 %v954_v2  ;;  %1530 = vmatpush.msrb.mxu1 %v1266_v9  ;;  %v447_v2 = vld [vmem:[%s3192_s15 + $0xd8] sm:$0xff]  ;;  %v642_v9 = vld [vmem:[%s3192_s15 + $0x6f0] sm:$0xff] }
  0x5c   : > { %1467 = vmatpush.msra.mxu2 %v927_v42  ;;  %1491 = vmatpush.msrb.mxu3 %v1239_v43  ;;  %v499_v42 = vld [vmem:[%s3192_s15 + $0x278] sm:$0xff]  ;;  %v799_v4 = vunpack.c.l.bf16 %v447_v2 }
  0x5d   : > { %1507 = vmatpush.msra.mxu0 %v928_v8  ;;  %1531 = vmatpush.msrb.mxu1 %v1240_v14  ;;  %v707_v43 = vld [vmem:[%s3192_s15 + $0x8f8] sm:$0xff]  ;;  %v903_v44 = vunpack.c.l.bf16 %v499_v42  ;;  %v904_v0 = vunpack.c.h.bf16 %v499_v42  ;;  %v434_v8 = vld [vmem:[%s3192_s15 + $0x70] sm:$0xff] }
  0x5e   : > { %1468 = vmatpush.msra.mxu2 %v901_v46  ;;  %1492 = vmatpush.msrb.mxu3 %v1213_v47  ;;  %v1319_v45 = vunpack.c.l.bf16 %v707_v43  ;;  %v982_v46 = vunpack.c.h.bf16 %v538_v25  ;;  %v746_v47 = vunpack.c.h.bf16 %v3282_v6  ;;  %v878_v6 = vunpack.c.h.bf16 %v486_v48  ;;  %v331_v14 = vld [vmem:[#allocation6] sm:$0x3] }
  0x5f   : > { %1508 = vmatpush.msra.mxu0 %v902_v13  ;;  %1532 = vmatpush.msrb.mxu1 %v1214_v19  ;;  %v773_v10 = vunpack.c.l.bf16 %v434_v8  ;;  %v826_v19 = vunpack.c.h.bf16 %v460_v60  ;;  %v774_v25 = vunpack.c.h.bf16 %v434_v8  ;;  %v333_v31 = vperm.slane %v331_v14, 0 }
  0x60   : > { %1469 = vmatpush.msra.mxu2 %v875_v50  ;;  %1493 = vmatpush.msrb.mxu3 %v1187_v51  ;;  %v877_v50 = vunpack.c.l.bf16 %v486_v48  ;;  %v1293_v51 = vunpack.c.l.bf16 %v694_v49  ;;  %v617_v48 = vld [vmem:[%s3192_s15 + $0x628] sm:$0xff] }
  0x61   : > { %1509 = vmatpush.msra.mxu0 %v876_v18  ;;  %1533 = vmatpush.msrb.mxu1 %v1188_v24 }
  0x62   : > { %1470 = vmatpush.msra.mxu2 %v849_v54  ;;  %1494 = vmatpush.msrb.mxu3 %v1161_v55  ;;  %v473_v54 = vld [vmem:[%s3192_s15 + $0x1a8] sm:$0xff] }
  0x63   : > { %1510 = vmatpush.msra.mxu0 %v850_v23  ;;  %1534 = vmatpush.msrb.mxu1 %v1162_v29  ;;  %v681_v55 = vld [vmem:[%s3192_s15 + $0x828] sm:$0xff]  ;;  %v1216_v23 = vunpack.c.h.bf16 %v655_v3 }
  0x64   : > { %1539 = vmatpush.msra.mxu3 %v1137_v56  ;;  %1471 = vmatpush.msra.mxu2 %v823_v57  ;;  %v851_v56 = vunpack.c.l.bf16 %v473_v54  ;;  %v1267_v57 = vunpack.c.l.bf16 %v681_v55  ;;  %v1268_v13 = vunpack.c.h.bf16 %v681_v55  ;;  %v3326_v55 = vld [vmem:[%s3192_s15 + $0x968] sm:$0xff] }
  0x65   : > { %1511 = vmatpush.msra.mxu0 %v824_v28  ;;  %1566 = vmatpush.msra.mxu1 %v1371_v33  ;;  %v748_v28 = vunpack.c.h.bf16 %v421_v15 }
  0x66   : > { %1472 = vmatpush.msra.mxu2 %v797_v59  ;;  %1540 = vmatpush.msra.mxu3 %v1111_v63  ;;  %v1346_v59 = vunpack.c.h.bf16 %v720_v37  ;;  %v1241_v63 = vunpack.c.l.bf16 %v668_v61  ;;  %v3331_v61 = vld [vmem:[%s3192_s15 + $0x558] sm:$0xff] }
  0x67   : > { %1512 = vmatpush.msra.mxu0 %v798_v35  ;;  %1567 = vmatpush.msra.mxu1 %v1345_v39 }
  0x68   : > { %1473 = vmatpush.msra.mxu2 %v771_v1  ;;  %1541 = vmatpush.msra.mxu3 %v1085_v5  ;;  %v1320_v1 = vunpack.c.h.bf16 %v707_v43  ;;  %v1215_v5 = vunpack.c.l.bf16 %v655_v3  ;;  %v3346_v3 = vld [vmem:[%s3192_s15 + $0x898] sm:$0xff] }
  0x69   : > { %1513 = vmatpush.msra.mxu0 %v772_v41  ;;  %1568 = vmatpush.msra.mxu1 %v1319_v45 }
  0x6a   : > { %1474 = vmatpush.msra.mxu2 %v745_v7  ;;  %1542 = vmatpush.msra.mxu3 %v1059_v11  ;;  %v1294_v7 = vunpack.c.h.bf16 %v694_v49  ;;  %v1189_v11 = vunpack.c.l.bf16 %v642_v9 }
  0x6b   : > { %1514 = vmatpush.msra.mxu0 %v746_v47  ;;  %1569 = vmatpush.msra.mxu1 %v1293_v51 }
  0x6c   : > { %1579 = vmatpush.msrb.mxu2 %v1138_v12  ;;  %1543 = vmatpush.msra.mxu3 %v1033_v16  ;;  %v852_v12 = vunpack.c.h.bf16 %v473_v54  ;;  %v629_v16 = vld [vmem:[%s3192_s15 + $0x688] sm:$0xff]  ;;  %v3323_v54 = vld [vmem:[%s3192_s15 + $0x5c0] sm:$0xff] }
  0x6d   : > { %1606 = vmatpush.msrb.mxu0 %v1372_v53  ;;  %1570 = vmatpush.msra.mxu1 %v1267_v57  ;;  %v1163_v18 = vunpack.c.l.bf16 %v629_v16  ;;  %v1164_v29 = vunpack.c.h.bf16 %v629_v16  ;;  %v1139_v53 = vunpack.c.l.bf16 %v617_v48 }
  0x6e   : > { %1580 = vmatpush.msrb.mxu2 %v1112_v17  ;;  %1544 = vmatpush.msra.mxu3 %v1007_v21  ;;  %v747_v17 = vunpack.c.l.bf16 %v421_v15  ;;  %v334_v21 = vperm.slane %v331_v14, 1  ;;  %v1140_v15 = vunpack.c.h.bf16 %v617_v48 }
  0x6f   : > { %1607 = vmatpush.msrb.mxu0 %v1346_v59  ;;  %1571 = vmatpush.msra.mxu1 %v1241_v63  ;;  %v1113_v63 = vunpack.c.l.bf16 %v3323_v54 }
  0x70   : > { %1581 = vmatpush.msrb.mxu2 %v1086_v22  ;;  %1545 = vmatpush.msra.mxu3 %v981_v26  ;;  %v800_v22 = vunpack.c.h.bf16 %v447_v2  ;;  %v1190_v26 = vunpack.c.h.bf16 %v642_v9  ;;  %v3343_v2 = vld [vmem:[%s3192_s15 + $0x4f0] sm:$0xff] }
  0x71   : > { %1608 = vmatpush.msrb.mxu0 %v1320_v1  ;;  %1572 = vmatpush.msra.mxu1 %v1215_v5 }
  0x72   : > { %1582 = vmatpush.msrb.mxu2 %v1060_v27  ;;  %1546 = vmatpush.msra.mxu3 %v955_v32 }
  0x73   : > { %1609 = vmatpush.msrb.mxu0 %v1294_v7  ;;  %1573 = vmatpush.msra.mxu1 %v1189_v11  ;;  %v1295_v11 = vunpack.c.l.bf16 %v3346_v3 }
  0x74   : > { %1583 = vmatpush.msrb.mxu2 %v1034_v34  ;;  %1547 = vmatpush.msra.mxu3 %v929_v38 }
  0x75   : > { %1610 = vmatpush.msrb.mxu0 %v1268_v13  ;;  %1574 = vmatpush.msra.mxu1 %v1163_v18  ;;  %v3356_v13 = vld [vmem:[%s3192_s15 + $0x830] sm:$0xff]  ;;  %v3364_v18 = vld [vmem:[%s3192_s15 + $0x7c8] sm:$0xff] }
  0x76   : > { %1584 = vmatpush.msrb.mxu2 %v1008_v40  ;;  %1548 = vmatpush.msra.mxu3 %v903_v44 }
  0x77   : > { %1611 = vmatpush.msrb.mxu0 %v1242_v20  ;;  %v1269_v20 = vunpack.c.l.bf16 %v3356_v13 }
  0x78   : > { %1585 = vmatpush.msrb.mxu2 %v982_v46  ;;  %1549 = vmatpush.msra.mxu3 %v877_v50  ;;  %v734_v50 = vld [vmem:[%s3192_s15 + $0x9d0] sm:$0xff] }
  0x79   : > { %1612 = vmatpush.msrb.mxu0 %v1216_v23  ;;  %v1374_v16 = vunpack.c.h.bf16 %v734_v50  ;;  %v3373_v23 = vld [vmem:[%s3192_s15 + $0x3b8] sm:$0xff] }
  0x7a   : > { %1586 = vmatpush.msrb.mxu2 %v956_v52  ;;  %1550 = vmatpush.msra.mxu3 %v851_v56 }
  0x7b   : > { %1613 = vmatpush.msrb.mxu0 %v1190_v26  ;;  %v1243_v26 = vunpack.c.l.bf16 %v3364_v18 }
  0x7c   : > { %1587 = vmatpush.msrb.mxu2 %v930_v58  ;;  %1551 = vmatpush.msra.mxu3 %v825_v62  ;;  %v1373_v58 = vunpack.c.l.bf16 %v734_v50  ;;  %v3334_v62 = vld [vmem:[%s3192_s15 + $0x900] sm:$0xff] }
  0x7d   : > { %1614 = vmatpush.msrb.mxu0 %v1164_v29  ;;  %v1321_v7 = vunpack.c.l.bf16 %v3334_v62  ;;  %v983_v29 = vunpack.c.l.bf16 %v3373_v23 }
  0x7e   : > { %1588 = vmatpush.msrb.mxu2 %v904_v0  ;;  %1552 = vmatpush.msra.mxu3 %v799_v4  ;;  %v1347_v0 = vunpack.c.l.bf16 %v3326_v55 }
  0x80   : > { %1589 = vmatpush.msrb.mxu2 %v878_v6  ;;  %1553 = vmatpush.msra.mxu3 %v773_v10  ;;  %v1087_v6 = vunpack.c.l.bf16 %v3331_v61  ;;  %v1061_v10 = vunpack.c.l.bf16 %v3343_v2 }
  0x82   : > { %1590 = vmatpush.msrb.mxu2 %v852_v12  ;;  %1554 = vmatpush.msra.mxu3 %v747_v17  ;;  %v3353_v12 = vld [vmem:[%s3192_s15 + $0x488] sm:$0xff]  ;;  %v3361_v17 = vld [vmem:[%s3192_s15 + $0x420] sm:$0xff] }
  0x84   : > { %1591 = vmatpush.msrb.mxu2 %v826_v19  ;;  %v1035_v19 = vunpack.c.l.bf16 %v3353_v12 }
  0x86   : > { %1592 = vmatpush.msrb.mxu2 %v800_v22  ;;  %v1348_v22 = vunpack.c.h.bf16 %v3326_v55  ;;  %v3433_v55 = vld [vmem:[%s3192_s15 + $0x560] sm:$0xff] }
  0x88   : > { %1593 = vmatpush.msrb.mxu2 %v774_v25  ;;  %v1009_v25 = vunpack.c.l.bf16 %v3361_v17 }
  0x8a   : > { %1594 = vmatpush.msrb.mxu2 %v748_v28  ;;  %v1322_v28 = vunpack.c.h.bf16 %v3334_v62  ;;  %v3445_v62 = vld [vmem:[%s3192_s15 + $0x4f8] sm:$0xff] }
  0xce   : > { %v387_v24 = vpop.f32.mrf.mxu1 }
  0xcf   : > { %v388_v27 = vadd.f32 %v387_v24, %v334_v21  ;;  %v1114_v21 = vunpack.c.h.bf16 %v3323_v54  ;;  %v3376_v24 = vld [vmem:[%s3192_s15 + $0x760] sm:$0xff] }
  0xd1   : > { %v393_v30 = vand.u32 2147483647, %v388_v27  ;;  %v391_v52 = vmax.f32 %v388_v27, 0.0  ;;  %v1088_v27 = vunpack.c.h.bf16 %v3331_v61 }
  0xd3   : > { %v395_v32 = vsub.f32 0.0, %v393_v30  ;;  %v1217_v30 = vunpack.c.l.bf16 %v3376_v24 }
  0xd4   : > { %v367_v33 = vpop.f32.mrf.mxu3 }
  0xd5   : > { %v398_v34 = vmul.f32 1.442695, %v395_v32  ;;  %v368_v35 = vadd.f32 %v367_v33, %v333_v31  ;;  %v3388_v31 = vld [vmem:[%s3192_s15 + $0x350] sm:$0xff]  ;;  %v3391_v32 = vld [vmem:[%s3192_s15 + $0x6f8] sm:$0xff]  ;;  %v1062_v33 = vunpack.c.h.bf16 %v3343_v2 }
  0xd7   : > { %2824 = vpow2.f32 %v398_v34  ;;  %v392_v36 = vand.u32 2147483647, %v368_v35  ;;  %v390_v8 = vmax.f32 %v368_v35, 0.0  ;;  %v1296_v34 = vunpack.c.h.bf16 %v3346_v3  ;;  %v3396_v35 = vld [vmem:[%s3192_s15 + $0x2e8] sm:$0xff]  ;;  %v3452_v3 = vld [vmem:[%s3192_s15 + $0x490] sm:$0xff] }
  0xd9   : > { %v394_v37 = vsub.f32 0.0, %v392_v36  ;;  %v3399_v36 = vld [vmem:[%s3192_s15 + $0x690] sm:$0xff] }
  0xdb   : > { %v396_v38 = vmul.f32 1.442695, %v394_v37  ;;  %v957_v37 = vunpack.c.l.bf16 %v3388_v31 }
  0xdd   : > { %v2825_v39 = vpop.eup %2824  ;;  %2826 = vpow2.f32 %v396_v38  ;;  %v1191_v38 = vunpack.c.l.bf16 %v3391_v32 }
  0xde   : > { %v409_v40 = vadd.f32 1.0, %v2825_v39  ;;  %v412_v41 = vmul.f32 -0.5, %v2825_v39  ;;  %v415_v43 = vand.u32 2147483647, %v2825_v39 }
  0xe0   : > { %2828 = vlog2.f32 %v409_v40  ;;  %v413_v42 = vadd.f32 1.0, %v412_v41  ;;  %vm416_vm2 = vcmp.lt.f32.partialorder %v415_v43, 0.0004427343  ;;  %v1270_v40 = vunpack.c.h.bf16 %v3356_v13  ;;  %v3406_v41 = vld [vmem:[%s3192_s15 + $0x280] sm:$0xff] }
  0xe1   : > { %v1165_v43 = vunpack.c.l.bf16 %v3399_v36  ;;  %v905_v48 = vunpack.c.l.bf16 %v3406_v41 }
  0xe2   : > { %v414_v46 = vmul.f32 %v2825_v39, %v413_v42  ;;  %v1036_v39 = vunpack.c.h.bf16 %v3353_v12  ;;  %v931_v42 = vunpack.c.l.bf16 %v3396_v35 }
  0xe3   : > { %v2827_v44 = vpop.eup %2826 }
  0xe4   : > { %v400_v45 = vadd.f32 1.0, %v2827_v44  ;;  %v403_v47 = vmul.f32 -0.5, %v2827_v44  ;;  %v406_v60 = vand.u32 2147483647, %v2827_v44 }
  0xe6   : > { %v2829_v49 = vpop.eup %2828  ;;  %2830 = vlog2.f32 %v400_v45  ;;  %v404_v57 = vadd.f32 1.0, %v403_v47  ;;  %vm407_vm4 = vcmp.lt.f32.partialorder %v406_v60, 0.0004427343  ;;  %v1010_v45 = vunpack.c.h.bf16 %v3361_v17  ;;  %v3419_v47 = vld [vmem:[%s3192_s15 + $0x218] sm:$0xff] }
  0xe7   : > { %v411_v51 = vmul.f32 0.6931472, %v2829_v49  ;;  %v3423_v49 = vld [vmem:[%s3192_s15 + $0x5c8] sm:$0xff]  ;;  %v879_v54 = vunpack.c.l.bf16 %v3419_v47  ;;  %v1192_v60 = vunpack.c.h.bf16 %v3391_v32  ;;  %v880_v13 = vunpack.c.h.bf16 %v3419_v47  ;;  %v3528_v47 = vld [vmem:[%s3192_s15 + $0x838] sm:$0xff] }
  0xe8   : > { %v405_v5 = vmul.f32 %v2827_v44, %v404_v57  ;;  %v3411_v44 = vld [vmem:[%s3192_s15 + $0x630] sm:$0xff]  ;;  %v958_v57 = vunpack.c.h.bf16 %v3388_v31  ;;  %v1116_v12 = vunpack.c.h.bf16 %v3423_v49  ;;  %v1038_v31 = vunpack.c.h.bf16 %v3452_v3  ;;  %v3502_v32 = vld [vmem:[%s3192_s15 + $0x288] sm:$0xff] }
  0xe9   : > { %v417_v56 = vsel %vm416_vm2, %v414_v46, %v411_v51  ;;  %v1244_v46 = vunpack.c.h.bf16 %v3364_v18  ;;  %v1141_v50 = vunpack.c.l.bf16 %v3411_v44  ;;  %v984_v51 = vunpack.c.h.bf16 %v3373_v23 }
  0xea   : > { %v3328_v59 = vadd.f32 %v417_v56, %v391_v52  ;;  %v3428_v52 = vld [vmem:[%s3192_s15 + $0x1b0] sm:$0xff]  ;;  %v1115_v56 = vunpack.c.l.bf16 %v3423_v49 }
  0xeb   : > { %v853_v61 = vunpack.c.l.bf16 %v3428_v52 }
  0xec   : > { %v2831_v1 = vpop.eup %2830  ;;  %2714 = vmatmul.msk.f32.vlgmr.msrb.gmra.mxu3 %vm1455_vm3, %v3328_v59  ;;  %2715 = vmatmul.msk.f32.vlgmr.msrb.gmra.mxu1 %vm1455_vm3, %v3328_v59 }
  0xed   : > { %v402_v4 = vmul.f32 0.6931472, %v2831_v1  ;;  %1619 = vmatpush.msrb.mxu1 %v1139_v53  ;;  %1646 = vmatpush.msrb.mxu3 %v1373_v58  ;;  %v1218_v53 = vunpack.c.h.bf16 %v3376_v24  ;;  %v3438_v58 = vld [vmem:[%s3192_s15 + $0x148] sm:$0xff]  ;;  %v1166_v1 = vunpack.c.h.bf16 %v3399_v36  ;;  %v3488_v24 = vld [vmem:[%s3192_s15 + $0x9d8] sm:$0xff] }
  0xee   : > { %v827_v2 = vunpack.c.l.bf16 %v3438_v58 }
  0xef   : > { %v408_v9 = vsel %vm407_vm4, %v405_v5, %v402_v4  ;;  %1620 = vmatpush.msrb.mxu1 %v1113_v63  ;;  %1647 = vmatpush.msrb.mxu3 %v1347_v0  ;;  %v1089_v63 = vunpack.c.l.bf16 %v3433_v55  ;;  %v932_v0 = vunpack.c.h.bf16 %v3396_v35  ;;  %v3455_v4 = vld [vmem:[%s3192_s15 + $0xe0] sm:$0xff]  ;;  %v1063_v5 = vunpack.c.l.bf16 %v3445_v62  ;;  %v3507_v35 = vld [vmem:[%s3192_s15 + $0x908] sm:$0xff] }
  0xf0   : > { %v3358_v14 = vadd.f32 %v408_v9, %v390_v8  ;;  %v3461_v8 = vld [vmem:[%s3192_s15 + $0x428] sm:$0xff]  ;;  %v3464_v9 = vld [vmem:[%s3192_s15 + $0x78] sm:$0xff] }
  0xf1   : > { %1621 = vmatpush.msrb.mxu1 %v1087_v6  ;;  %1648 = vmatpush.msrb.mxu3 %v1321_v7  ;;  %v1142_v6 = vunpack.c.h.bf16 %v3411_v44  ;;  %v906_v7 = vunpack.c.h.bf16 %v3406_v41  ;;  %v1011_v17 = vunpack.c.l.bf16 %v3461_v8  ;;  %v775_v18 = vunpack.c.l.bf16 %v3464_v9  ;;  %v3518_v41 = vld [vmem:[%s3192_s15 + $0x8a0] sm:$0xff] }
  0xf2   : > { %1475 = vmatmul.f32.vlgmr.msra.gmra.mxu2 %v3358_v14  ;;  %1515 = vmatmul.f32.vlgmr.msra.gmra.mxu0 %v3358_v14 }
  0xf3   : > { %1622 = vmatpush.msrb.mxu1 %v1061_v10  ;;  %1649 = vmatpush.msrb.mxu3 %v1295_v11  ;;  %v1037_v10 = vunpack.c.l.bf16 %v3452_v3  ;;  %v801_v11 = vunpack.c.l.bf16 %v3455_v4 }
  0xf4   : > { %1659 = vmatpush.msra.mxu0 %v1140_v15  ;;  %1686 = vmatpush.msra.mxu2 %v1374_v16  ;;  %v3471_v15 = vld [vmem:[%s3192_s15 + $0x3c0] sm:$0xff]  ;;  %v3474_v16 = vld [vmem:[%s3192_s15 + $0x10] sm:$0xff] }
  0xf5   : > { %1555 = vmatmul.f32.vlgmr.msra.gmra.mxu3 %v3358_v14  ;;  %2716 = vmatmul.msk.f32.vlgmr.msra.gmra.mxu1 %vm1455_vm3, %v3328_v59  ;;  %v749_v23 = vunpack.c.l.bf16 %v3474_v16  ;;  %v750_v44 = vunpack.c.h.bf16 %v3474_v16  ;;  %v3580_v16 = vld [vmem:[%s3192_s15 + $0x9e0] sm:$0xff] }
  0xf6   : > { %1623 = vmatpush.msrb.mxu1 %v1035_v19  ;;  %1650 = vmatpush.msrb.mxu3 %v1269_v20  ;;  %v1090_v19 = vunpack.c.h.bf16 %v3433_v55  ;;  %v854_v20 = vunpack.c.h.bf16 %v3428_v52  ;;  %v3537_v52 = vld [vmem:[%s3192_s15 + $0x7d0] sm:$0xff] }
  0xf7   : > { %1660 = vmatpush.msra.mxu0 %v1114_v21  ;;  %1687 = vmatpush.msra.mxu2 %v1348_v22  ;;  %v3483_v21 = vld [vmem:[%s3192_s15 + $0x358] sm:$0xff]  ;;  %v985_v22 = vunpack.c.l.bf16 %v3471_v15 }
  0xf8   : > { %1624 = vmatpush.msrb.mxu1 %v1009_v25  ;;  %1651 = vmatpush.msrb.mxu3 %v1243_v26  ;;  %v1064_v25 = vunpack.c.h.bf16 %v3445_v62  ;;  %v828_v26 = vunpack.c.h.bf16 %v3438_v58  ;;  %v960_v49 = vunpack.c.h.bf16 %v3483_v21  ;;  %v3547_v58 = vld [vmem:[%s3192_s15 + $0x768] sm:$0xff]  ;;  %v908_v62 = vunpack.c.h.bf16 %v3502_v32 }
  0xf9   : > { %1661 = vmatpush.msra.mxu0 %v1088_v27  ;;  %1688 = vmatpush.msra.mxu2 %v1322_v28  ;;  %v3493_v27 = vld [vmem:[%s3192_s15 + $0x2f0] sm:$0xff]  ;;  %v959_v28 = vunpack.c.l.bf16 %v3483_v21  ;;  %v1219_v3 = vunpack.c.l.bf16 %v3547_v58 }
  0xfa   : > { %1625 = vmatpush.msrb.mxu1 %v983_v29  ;;  %1652 = vmatpush.msrb.mxu3 %v1217_v30  ;;  %v3497_v29 = vld [vmem:[%s3192_s15 + $0x970] sm:$0xff]  ;;  %v1375_v30 = vunpack.c.l.bf16 %v3488_v24  ;;  %v934_v55 = vunpack.c.h.bf16 %v3493_v27 }
  0xfb   : > { %1662 = vmatpush.msra.mxu0 %v1062_v33  ;;  %1689 = vmatpush.msra.mxu2 %v1296_v34  ;;  %v802_v33 = vunpack.c.h.bf16 %v3455_v4  ;;  %v933_v34 = vunpack.c.l.bf16 %v3493_v27  ;;  %v1349_v36 = vunpack.c.l.bf16 %v3497_v29 }
  0xfc   : > { %1595 = vmatmul.f32.vlgmr.msrb.gmra.mxu2 %v3358_v14  ;;  %2717 = vmatmul.msk.f32.vlgmr.msrb.gmra.mxu0 %vm1455_vm3, %v3328_v59 }
  0xfd   : > { %1626 = vmatpush.msrb.mxu1 %v957_v37  ;;  %1653 = vmatpush.msrb.mxu3 %v1191_v38  ;;  %v1012_v37 = vunpack.c.h.bf16 %v3461_v8  ;;  %v3512_v38 = vld [vmem:[%s3192_s15 + $0x220] sm:$0xff] }
  0xfe   : > { %1663 = vmatpush.msra.mxu0 %v1036_v39  ;;  %1690 = vmatpush.msra.mxu2 %v1270_v40  ;;  %v776_v39 = vunpack.c.h.bf16 %v3464_v9  ;;  %v907_v40 = vunpack.c.l.bf16 %v3502_v32  ;;  %v882_v4 = vunpack.c.h.bf16 %v3512_v38 }
  0xff   : > { %1627 = vmatpush.msrb.mxu1 %v931_v42  ;;  %1654 = vmatpush.msrb.mxu3 %v1165_v43  ;;  %v1323_v42 = vunpack.c.l.bf16 %v3507_v35  ;;  %v986_v43 = vunpack.c.h.bf16 %v3471_v15  ;;  %v3577_v15 = vld [vmem:[%s3192_s15 + $0x638] sm:$0xff] }
 0x100   : > { %1664 = vmatpush.msra.mxu0 %v1010_v45  ;;  %1691 = vmatpush.msra.mxu2 %v1244_v46  ;;  %v881_v45 = vunpack.c.l.bf16 %v3512_v38  ;;  %v3525_v46 = vld [vmem:[%s3192_s15 + $0x1b8] sm:$0xff]  ;;  %v1143_v21 = vunpack.c.l.bf16 %v3577_v15  ;;  %v3621_v38 = vld [vmem:[%s3192_s15 + $0x840] sm:$0xff] }
 0x101   : > { %2718 = vmatmul.msk.f32.vlgmr.msrb.gmra.mxu3 %vm1455_vm3, %v3328_v59  ;;  %1628 = vmatpush.msrb.mxu1 %v905_v48  ;;  %v1297_v48 = vunpack.c.l.bf16 %v3518_v41 }
 0x102   : > { %1699 = vmatpush.msra.mxu3 %v1141_v50  ;;  %1665 = vmatpush.msra.mxu0 %v984_v51  ;;  %v1376_v50 = vunpack.c.h.bf16 %v3488_v24  ;;  %v3534_v51 = vld [vmem:[%s3192_s15 + $0x150] sm:$0xff]  ;;  %v1220_v24 = vunpack.c.h.bf16 %v3547_v58 }
 0x103   : > { %1692 = vmatpush.msra.mxu2 %v1218_v53  ;;  %1629 = vmatpush.msrb.mxu1 %v879_v54  ;;  %v855_v53 = vunpack.c.l.bf16 %v3525_v46  ;;  %v1271_v54 = vunpack.c.l.bf16 %v3528_v47 }
 0x104   : > { %1700 = vmatpush.msra.mxu3 %v1115_v56  ;;  %1666 = vmatpush.msra.mxu0 %v958_v57  ;;  %v1350_v56 = vunpack.c.h.bf16 %v3497_v29  ;;  %v3544_v57 = vld [vmem:[%s3192_s15 + $0xe8] sm:$0xff] }
 0x105   : > { %1693 = vmatpush.msra.mxu2 %v1192_v60  ;;  %1630 = vmatpush.msrb.mxu1 %v853_v61  ;;  %v829_v60 = vunpack.c.l.bf16 %v3534_v51  ;;  %v1245_v61 = vunpack.c.l.bf16 %v3537_v52 }
 0x106   : > { %1701 = vmatpush.msra.mxu3 %v1089_v63  ;;  %1667 = vmatpush.msra.mxu0 %v932_v0  ;;  %v1324_v63 = vunpack.c.h.bf16 %v3507_v35  ;;  %v3555_v0 = vld [vmem:[%s3192_s15 + $0x80] sm:$0xff] }
 0x107   : > { %1694 = vmatpush.msra.mxu2 %v1166_v1  ;;  %1631 = vmatpush.msrb.mxu1 %v827_v2  ;;  %v3558_v1 = vld [vmem:[%s3192_s15 + $0x700] sm:$0xff]  ;;  %v803_v2 = vunpack.c.l.bf16 %v3544_v57  ;;  %v777_v8 = vunpack.c.l.bf16 %v3555_v0  ;;  %v778_v29 = vunpack.c.h.bf16 %v3555_v0 }
 0x108   : > { %2719 = vmatmul.msk.f32.vlgmr.msra.gmra.mxu2 %vm1455_vm3, %v3328_v59  ;;  %1702 = vmatpush.msra.mxu3 %v1063_v5  ;;  %v1298_v5 = vunpack.c.h.bf16 %v3518_v41  ;;  %v1193_v9 = vunpack.c.l.bf16 %v3558_v1  ;;  %v1144_v41 = vunpack.c.h.bf16 %v3577_v15 }
 0x109   : > { %1739 = vmatpush.msrb.mxu2 %v1142_v6  ;;  %1668 = vmatpush.msra.mxu0 %v906_v7  ;;  %v3565_v6 = vld [vmem:[%s3192_s15 + $0x18] sm:$0xff] }
 0x10a   : > { %1703 = vmatpush.msra.mxu3 %v1037_v10  ;;  %1632 = vmatpush.msrb.mxu1 %v801_v11  ;;  %v3568_v7 = vld [vmem:[%s3192_s15 + $0x698] sm:$0xff]  ;;  %v856_v10 = vunpack.c.h.bf16 %v3525_v46  ;;  %v1272_v11 = vunpack.c.h.bf16 %v3528_v47  ;;  %v752_v35 = vunpack.c.h.bf16 %v3565_v6  ;;  %v1273_v46 = vunpack.c.l.bf16 %v3621_v38 }
 0x10b   : > { %1740 = vmatpush.msrb.mxu2 %v1116_v12  ;;  %1669 = vmatpush.msra.mxu0 %v880_v13  ;;  %v751_v12 = vunpack.c.l.bf16 %v3565_v6  ;;  %v1167_v13 = vunpack.c.l.bf16 %v3568_v7 }
 0x10c   : > { %1704 = vmatpush.msra.mxu3 %v1011_v17  ;;  %1633 = vmatpush.msrb.mxu1 %v775_v18  ;;  %v830_v17 = vunpack.c.h.bf16 %v3534_v51  ;;  %v1246_v18 = vunpack.c.h.bf16 %v3537_v52 }
 0x10d   : > { %1741 = vmatpush.msrb.mxu2 %v1090_v19  ;;  %1670 = vmatpush.msra.mxu0 %v854_v20  ;;  %v3585_v19 = vld [vmem:[%s3192_s15 + $0x5d0] sm:$0xff]  ;;  %v3588_v20 = vld [vmem:[%s3192_s15 + $0x978] sm:$0xff] }
 0x10e   : > { %1705 = vmatpush.msra.mxu3 %v985_v22  ;;  %1634 = vmatpush.msrb.mxu1 %v749_v23  ;;  %v1377_v22 = vunpack.c.l.bf16 %v3580_v16  ;;  %v804_v23 = vunpack.c.h.bf16 %v3544_v57  ;;  %v1117_v27 = vunpack.c.l.bf16 %v3585_v19  ;;  %v1118_v47 = vunpack.c.h.bf16 %v3585_v19  ;;  %v3695_v19 = vld [vmem:[%s3192_s15 + $0x570] sm:$0xff] }
 0x10f   : > { %1742 = vmatpush.msrb.mxu2 %v1064_v25  ;;  %1671 = vmatpush.msra.mxu0 %v828_v26  ;;  %v3595_v25 = vld [vmem:[%s3192_s15 + $0x568] sm:$0xff]  ;;  %v3598_v26 = vld [vmem:[%s3192_s15 + $0x910] sm:$0xff] }
 0x110   : > { %1635 = vmatmul.f32.vlgmr.msrb.gmra.mxu1 %v3358_v14  ;;  %1706 = vmatpush.msra.mxu3 %v959_v28  ;;  %v1351_v28 = vunpack.c.l.bf16 %v3588_v20  ;;  %v1325_v32 = vunpack.c.l.bf16 %v3598_v26 }
 0x111   : > { %1726 = vmatpush.msra.mxu1 %v1375_v30  ;;  %1743 = vmatpush.msrb.mxu2 %v1038_v31  ;;  %v1194_v30 = vunpack.c.h.bf16 %v3558_v1  ;;  %v1091_v31 = vunpack.c.l.bf16 %v3595_v25 }
 0x112   : > { %1672 = vmatpush.msra.mxu0 %v802_v33  ;;  %1707 = vmatpush.msra.mxu3 %v933_v34  ;;  %v3610_v33 = vld [vmem:[%s3192_s15 + $0x500] sm:$0xff]  ;;  %v3613_v34 = vld [vmem:[%s3192_s15 + $0x8a8] sm:$0xff] }
 0x113   : > { %1727 = vmatpush.msra.mxu1 %v1349_v36  ;;  %1744 = vmatpush.msrb.mxu2 %v1012_v37  ;;  %v1168_v36 = vunpack.c.h.bf16 %v3568_v7  ;;  %v3618_v37 = vld [vmem:[%s3192_s15 + $0x498] sm:$0xff]  ;;  %v3676_v7 = vld [vmem:[%s3192_s15 + $0x640] sm:$0xff] }
 0x114   : > { %1673 = vmatpush.msra.mxu0 %v776_v39  ;;  %1708 = vmatpush.msra.mxu3 %v907_v40  ;;  %v1065_v39 = vunpack.c.l.bf16 %v3610_v33  ;;  %v1299_v40 = vunpack.c.l.bf16 %v3613_v34 }
 0x115   : > { %1728 = vmatpush.msra.mxu1 %v1323_v42  ;;  %1745 = vmatpush.msrb.mxu2 %v986_v43  ;;  %v1378_v42 = vunpack.c.h.bf16 %v3580_v16  ;;  %v3628_v43 = vld [vmem:[%s3192_s15 + $0x430] sm:$0xff]  ;;  %v3690_v16 = vld [vmem:[%s3192_s15 + $0x1c0] sm:$0xff] }
 0x116   : > { %1674 = vmatpush.msra.mxu0 %v750_v44  ;;  %1709 = vmatpush.msra.mxu3 %v881_v45  ;;  %v3631_v44 = vld [vmem:[%s3192_s15 + $0x7d8] sm:$0xff]  ;;  %v1039_v45 = vunpack.c.l.bf16 %v3618_v37  ;;  %v1013_v51 = vunpack.c.l.bf16 %v3628_v43 }
 0x117   : > { %1675 = vmatmul.f32.vlgmr.msra.gmra.mxu0 %v3358_v14  ;;  %1729 = vmatpush.msra.mxu1 %v1297_v48  ;;  %v1352_v48 = vunpack.c.h.bf16 %v3588_v20  ;;  %v1247_v52 = vunpack.c.l.bf16 %v3631_v44 }
 0x118   : > { %1746 = vmatpush.msrb.mxu2 %v960_v49  ;;  %1766 = vmatpush.msrb.mxu0 %v1376_v50  ;;  %v3641_v49 = vld [vmem:[%s3192_s15 + $0x3c8] sm:$0xff]  ;;  %v3644_v50 = vld [vmem:[%s3192_s15 + $0x770] sm:$0xff] }
 0x119   : > { %1710 = vmatpush.msra.mxu3 %v855_v53  ;;  %1730 = vmatpush.msra.mxu1 %v1271_v54  ;;  %v1092_v53 = vunpack.c.h.bf16 %v3595_v25  ;;  %v1326_v54 = vunpack.c.h.bf16 %v3598_v26  ;;  %v987_v57 = vunpack.c.l.bf16 %v3641_v49  ;;  %v1221_v58 = vunpack.c.l.bf16 %v3644_v50  ;;  %v3707_v25 = vld [vmem:[%s3192_s15 + $0x508] sm:$0xff] }
 0x11a   : > { %1747 = vmatpush.msrb.mxu2 %v934_v55  ;;  %1767 = vmatpush.msrb.mxu0 %v1350_v56  ;;  %v3651_v55 = vld [vmem:[%s3192_s15 + $0x360] sm:$0xff]  ;;  %v3654_v56 = vld [vmem:[%s3192_s15 + $0x708] sm:$0xff]  ;;  %v988_v15 = vunpack.c.h.bf16 %v3641_v49  ;;  %v1093_v26 = vunpack.c.l.bf16 %v3695_v19 }
 0x11b   : > { %1711 = vmatpush.msra.mxu3 %v829_v60  ;;  %1731 = vmatpush.msra.mxu1 %v1245_v61  ;;  %v1066_v60 = vunpack.c.h.bf16 %v3610_v33  ;;  %v1300_v61 = vunpack.c.h.bf16 %v3613_v34  ;;  %v961_v0 = vunpack.c.l.bf16 %v3651_v55  ;;  %v1195_v1 = vunpack.c.l.bf16 %v3654_v56 }
 0x11c   : > { %1748 = vmatpush.msrb.mxu2 %v908_v62  ;;  %1768 = vmatpush.msrb.mxu0 %v1324_v63  ;;  %v3661_v62 = vld [vmem:[%s3192_s15 + $0x2f8] sm:$0xff]  ;;  %v3664_v63 = vld [vmem:[%s3192_s15 + $0x6a0] sm:$0xff]  ;;  %v1146_v33 = vunpack.c.h.bf16 %v3676_v7 }
 0x11d   : > { %1712 = vmatpush.msra.mxu3 %v803_v2  ;;  %1732 = vmatpush.msra.mxu1 %v1219_v3  ;;  %v1040_v2 = vunpack.c.h.bf16 %v3618_v37  ;;  %v1274_v3 = vunpack.c.h.bf16 %v3621_v38  ;;  %v1169_v6 = vunpack.c.l.bf16 %v3664_v63 }
 0x11e   : > { %1749 = vmatpush.msrb.mxu2 %v882_v4  ;;  %1769 = vmatpush.msrb.mxu0 %v1298_v5  ;;  %v3671_v4 = vld [vmem:[%s3192_s15 + $0x290] sm:$0xff]  ;;  %v935_v5 = vunpack.c.l.bf16 %v3661_v62 }
 0x11f   : > { %1713 = vmatpush.msra.mxu3 %v777_v8  ;;  %1733 = vmatpush.msra.mxu1 %v1193_v9  ;;  %v1014_v8 = vunpack.c.h.bf16 %v3628_v43  ;;  %v1248_v9 = vunpack.c.h.bf16 %v3631_v44  ;;  %v910_v34 = vunpack.c.h.bf16 %v3671_v4 }
 0x120   : > { %1750 = vmatpush.msrb.mxu2 %v856_v10  ;;  %1770 = vmatpush.msrb.mxu0 %v1272_v11  ;;  %v3681_v10 = vld [vmem:[%s3192_s15 + $0x228] sm:$0xff]  ;;  %v909_v11 = vunpack.c.l.bf16 %v3671_v4  ;;  %v3780_v4 = vld [vmem:[%s3192_s15 + $0x8b0] sm:$0xff] }
 0x121   : > { %1714 = vmatpush.msra.mxu3 %v751_v12  ;;  %1734 = vmatpush.msra.mxu1 %v1167_v13  ;;  %v3685_v12 = vld [vmem:[%s3192_s15 + $0x5d8] sm:$0xff]  ;;  %v1145_v13 = vunpack.c.l.bf16 %v3676_v7 }
 0x122   : > { %1751 = vmatpush.msrb.mxu2 %v830_v17  ;;  %1771 = vmatpush.msrb.mxu0 %v1246_v18  ;;  %v1222_v17 = vunpack.c.h.bf16 %v3644_v50  ;;  %v883_v18 = vunpack.c.l.bf16 %v3681_v10  ;;  %v1119_v20 = vunpack.c.l.bf16 %v3685_v12  ;;  %v3750_v50 = vld [vmem:[%s3192_s15 + $0x9e8] sm:$0xff] }
 0x123   : > { %1715 = vmatmul.f32.vlgmr.msra.gmra.mxu3 %v3358_v14  ;;  %2720 = vmatmul.msk.f32.vlgmr.msra.gmra.mxu1 %vm1455_vm3, %v3328_v59 }
 0x124   : > { %1779 = vmatpush.msrb.mxu1 %v1143_v21  ;;  %1806 = vmatpush.msrb.mxu3 %v1377_v22  ;;  %v962_v21 = vunpack.c.h.bf16 %v3651_v55  ;;  %v3700_v22 = vld [vmem:[%s3192_s15 + $0x158] sm:$0xff]  ;;  %v3759_v55 = vld [vmem:[%s3192_s15 + $0x980] sm:$0xff] }
 0x125   : > { %1752 = vmatpush.msrb.mxu2 %v804_v23  ;;  %1772 = vmatpush.msrb.mxu0 %v1220_v24  ;;  %v1196_v23 = vunpack.c.h.bf16 %v3654_v56  ;;  %v857_v24 = vunpack.c.l.bf16 %v3690_v16  ;;  %v1379_v56 = vunpack.c.l.bf16 %v3750_v50 }
 0x126   : > { %1780 = vmatpush.msrb.mxu1 %v1117_v27  ;;  %1807 = vmatpush.msrb.mxu3 %v1351_v28  ;;  %v936_v27 = vunpack.c.h.bf16 %v3661_v62  ;;  %v1170_v28 = vunpack.c.h.bf16 %v3664_v63  ;;  %v3769_v62 = vld [vmem:[%s3192_s15 + $0x918] sm:$0xff]  ;;  %v1353_v63 = vunpack.c.l.bf16 %v3759_v55 }
 0x127   : > { %1753 = vmatpush.msrb.mxu2 %v778_v29  ;;  %1773 = vmatpush.msrb.mxu0 %v1194_v30  ;;  %v831_v29 = vunpack.c.l.bf16 %v3700_v22  ;;  %v3714_v30 = vld [vmem:[%s3192_s15 + $0x4a0] sm:$0xff] }
 0x128   : > { %1781 = vmatpush.msrb.mxu1 %v1091_v31  ;;  %1808 = vmatpush.msrb.mxu3 %v1325_v32  ;;  %v3717_v31 = vld [vmem:[%s3192_s15 + $0xf0] sm:$0xff]  ;;  %v1067_v32 = vunpack.c.l.bf16 %v3707_v25  ;;  %v1041_v37 = vunpack.c.l.bf16 %v3714_v30 }
 0x129   : > { %1754 = vmatpush.msrb.mxu2 %v752_v35  ;;  %1774 = vmatpush.msrb.mxu0 %v1168_v36  ;;  %v3723_v35 = vld [vmem:[%s3192_s15 + $0x438] sm:$0xff]  ;;  %v3726_v36 = vld [vmem:[%s3192_s15 + $0x88] sm:$0xff]  ;;  %v805_v38 = vunpack.c.l.bf16 %v3717_v31 }
 0x12a   : > { %1755 = vmatmul.f32.vlgmr.msrb.gmra.mxu2 %v3358_v14  ;;  %2721 = vmatmul.msk.f32.vlgmr.msrb.gmra.mxu0 %vm1455_vm3, %v3328_v59  ;;  %v1015_v43 = vunpack.c.l.bf16 %v3723_v35  ;;  %v779_v44 = vunpack.c.l.bf16 %v3726_v36 }
 0x12b   : > { %1782 = vmatpush.msrb.mxu1 %v1065_v39  ;;  %1809 = vmatpush.msrb.mxu3 %v1299_v40  ;;  %v1120_v39 = vunpack.c.h.bf16 %v3685_v12  ;;  %v884_v40 = vunpack.c.h.bf16 %v3681_v10  ;;  %v3790_v10 = vld [vmem:[%s3192_s15 + $0x848] sm:$0xff] }
 0x12c   : > { %1819 = vmatpush.msra.mxu0 %v1144_v41  ;;  %1846 = vmatpush.msra.mxu2 %v1378_v42  ;;  %v3733_v41 = vld [vmem:[%s3192_s15 + $0x3d0] sm:$0xff]  ;;  %v3736_v42 = vld [vmem:[%s3192_s15 + $0x20] sm:$0xff] }
 0x12d   : > { %1783 = vmatpush.msrb.mxu1 %v1039_v45  ;;  %1810 = vmatpush.msrb.mxu3 %v1273_v46  ;;  %v1094_v45 = vunpack.c.h.bf16 %v3695_v19  ;;  %v858_v46 = vunpack.c.h.bf16 %v3690_v16  ;;  %v753_v49 = vunpack.c.l.bf16 %v3736_v42  ;;  %v754_v7 = vunpack.c.h.bf16 %v3736_v42  ;;  %v3799_v16 = vld [vmem:[%s3192_s15 + $0x7e0] sm:$0xff]  ;;  %v3842_v42 = vld [vmem:[%s3192_s15 + $0x9f0] sm:$0xff] }
 0x12e   : > { %1820 = vmatpush.msra.mxu0 %v1118_v47  ;;  %1847 = vmatpush.msra.mxu2 %v1352_v48  ;;  %v3745_v47 = vld [vmem:[%s3192_s15 + $0x368] sm:$0xff]  ;;  %v989_v48 = vunpack.c.l.bf16 %v3733_v41 }
 0x12f   : > { %1784 = vmatpush.msrb.mxu1 %v1013_v51  ;;  %1811 = vmatpush.msrb.mxu3 %v1247_v52  ;;  %v1068_v51 = vunpack.c.h.bf16 %v3707_v25  ;;  %v832_v52 = vunpack.c.h.bf16 %v3700_v22  ;;  %v964_v12 = vunpack.c.h.bf16 %v3745_v47  ;;  %v3809_v22 = vld [vmem:[%s3192_s15 + $0x778] sm:$0xff] }
 0x130   : > { %1821 = vmatpush.msra.mxu0 %v1092_v53  ;;  %1848 = vmatpush.msra.mxu2 %v1326_v54  ;;  %v3755_v53 = vld [vmem:[%s3192_s15 + $0x300] sm:$0xff]  ;;  %v963_v54 = vunpack.c.l.bf16 %v3745_v47 }
 0x131   : > { %1785 = vmatpush.msrb.mxu1 %v987_v57  ;;  %1812 = vmatpush.msrb.mxu3 %v1221_v58  ;;  %v1042_v57 = vunpack.c.h.bf16 %v3714_v30  ;;  %v3764_v58 = vld [vmem:[%s3192_s15 + $0x298] sm:$0xff]  ;;  %v938_v19 = vunpack.c.h.bf16 %v3755_v53  ;;  %v1223_v30 = vunpack.c.l.bf16 %v3809_v22 }
 0x132   : > { %1822 = vmatpush.msra.mxu0 %v1066_v60  ;;  %1849 = vmatpush.msra.mxu2 %v1300_v61  ;;  %v806_v60 = vunpack.c.h.bf16 %v3717_v31  ;;  %v937_v61 = vunpack.c.l.bf16 %v3755_v53  ;;  %v912_v25 = vunpack.c.h.bf16 %v3764_v58 }
 0x133   : > { %1786 = vmatpush.msrb.mxu1 %v961_v0  ;;  %1813 = vmatpush.msrb.mxu3 %v1195_v1  ;;  %v1016_v0 = vunpack.c.h.bf16 %v3723_v35  ;;  %v3774_v1 = vld [vmem:[%s3192_s15 + $0x230] sm:$0xff] }
 0x134   : > { %1823 = vmatpush.msra.mxu0 %v1040_v2  ;;  %1850 = vmatpush.msra.mxu2 %v1274_v3  ;;  %v780_v2 = vunpack.c.h.bf16 %v3726_v36  ;;  %v911_v3 = vunpack.c.l.bf16 %v3764_v58  ;;  %v886_v31 = vunpack.c.h.bf16 %v3774_v1 }
 0x135   : > { %1787 = vmatpush.msrb.mxu1 %v935_v5  ;;  %1814 = vmatpush.msrb.mxu3 %v1169_v6  ;;  %v1327_v5 = vunpack.c.l.bf16 %v3769_v62  ;;  %v990_v6 = vunpack.c.h.bf16 %v3733_v41  ;;  %v3839_v41 = vld [vmem:[%s3192_s15 + $0x648] sm:$0xff] }
 0x136   : > { %1824 = vmatpush.msra.mxu0 %v1014_v8  ;;  %1851 = vmatpush.msra.mxu2 %v1248_v9  ;;  %v885_v8 = vunpack.c.l.bf16 %v3774_v1  ;;  %v3787_v9 = vld [vmem:[%s3192_s15 + $0x1c8] sm:$0xff]  ;;  %v1147_v47 = vunpack.c.l.bf16 %v3839_v41  ;;  %v3883_v1 = vld [vmem:[%s3192_s15 + $0x850] sm:$0xff] }
 0x137   : > { %2722 = vmatmul.msk.f32.vlgmr.msrb.gmra.mxu3 %vm1455_vm3, %v3328_v59  ;;  %1788 = vmatpush.msrb.mxu1 %v909_v11  ;;  %v1301_v11 = vunpack.c.l.bf16 %v3780_v4 }
 0x138   : > { %1859 = vmatpush.msra.mxu3 %v1145_v13  ;;  %1825 = vmatpush.msra.mxu0 %v988_v15  ;;  %v1380_v13 = vunpack.c.h.bf16 %v3750_v50  ;;  %v3796_v15 = vld [vmem:[%s3192_s15 + $0x160] sm:$0xff]  ;;  %v1224_v50 = vunpack.c.h.bf16 %v3809_v22 }
 0x139   : > { %1852 = vmatpush.msra.mxu2 %v1222_v17  ;;  %1789 = vmatpush.msrb.mxu1 %v883_v18  ;;  %v859_v17 = vunpack.c.l.bf16 %v3787_v9  ;;  %v1275_v18 = vunpack.c.l.bf16 %v3790_v10 }
 0x13a   : > { %1860 = vmatpush.msra.mxu3 %v1119_v20  ;;  %1826 = vmatpush.msra.mxu0 %v962_v21  ;;  %v1354_v20 = vunpack.c.h.bf16 %v3759_v55  ;;  %v3806_v21 = vld [vmem:[%s3192_s15 + $0xf8] sm:$0xff] }
 0x13b   : > { %1853 = vmatpush.msra.mxu2 %v1196_v23  ;;  %1790 = vmatpush.msrb.mxu1 %v857_v24  ;;  %v833_v23 = vunpack.c.l.bf16 %v3796_v15  ;;  %v1249_v24 = vunpack.c.l.bf16 %v3799_v16 }
 0x13c   : > { %1861 = vmatpush.msra.mxu3 %v1093_v26  ;;  %1827 = vmatpush.msra.mxu0 %v936_v27  ;;  %v1328_v26 = vunpack.c.h.bf16 %v3769_v62  ;;  %v3817_v27 = vld [vmem:[%s3192_s15 + $0x90] sm:$0xff] }
 0x13d   : > { %1854 = vmatpush.msra.mxu2 %v1170_v28  ;;  %1791 = vmatpush.msrb.mxu1 %v831_v29  ;;  %v3820_v28 = vld [vmem:[%s3192_s15 + $0x710] sm:$0xff]  ;;  %v807_v29 = vunpack.c.l.bf16 %v3806_v21  ;;  %v781_v35 = vunpack.c.l.bf16 %v3817_v27  ;;  %v782_v55 = vunpack.c.h.bf16 %v3817_v27 }
 0x13e   : > { %2723 = vmatmul.msk.f32.vlgmr.msra.gmra.mxu2 %vm1455_vm3, %v3328_v59  ;;  %1862 = vmatpush.msra.mxu3 %v1067_v32  ;;  %v1302_v32 = vunpack.c.h.bf16 %v3780_v4  ;;  %v1197_v36 = vunpack.c.l.bf16 %v3820_v28  ;;  %v1148_v4 = vunpack.c.h.bf16 %v3839_v41 }
 0x13f   : > { %1899 = vmatpush.msrb.mxu2 %v1146_v33  ;;  %1828 = vmatpush.msra.mxu0 %v910_v34  ;;  %v3827_v33 = vld [vmem:[%s3192_s15 + $0x28] sm:$0xff] }
 0x140   : > { %1863 = vmatpush.msra.mxu3 %v1041_v37  ;;  %1792 = vmatpush.msrb.mxu1 %v805_v38  ;;  %v3830_v34 = vld [vmem:[%s3192_s15 + $0x6a8] sm:$0xff]  ;;  %v860_v37 = vunpack.c.h.bf16 %v3787_v9  ;;  %v1276_v38 = vunpack.c.h.bf16 %v3790_v10  ;;  %v756_v62 = vunpack.c.h.bf16 %v3827_v33  ;;  %v1277_v9 = vunpack.c.l.bf16 %v3883_v1 }
 0x141   : > { %1900 = vmatpush.msrb.mxu2 %v1120_v39  ;;  %1829 = vmatpush.msra.mxu0 %v884_v40  ;;  %v755_v39 = vunpack.c.l.bf16 %v3827_v33  ;;  %v1171_v40 = vunpack.c.l.bf16 %v3830_v34 }
 0x142   : > { %1864 = vmatpush.msra.mxu3 %v1015_v43  ;;  %1793 = vmatpush.msrb.mxu1 %v779_v44  ;;  %v834_v43 = vunpack.c.h.bf16 %v3796_v15  ;;  %v1250_v44 = vunpack.c.h.bf16 %v3799_v16 }
 0x143   : > { %1901 = vmatpush.msrb.mxu2 %v1094_v45  ;;  %1830 = vmatpush.msra.mxu0 %v858_v46  ;;  %v3847_v45 = vld [vmem:[%s3192_s15 + $0x5e0] sm:$0xff]  ;;  %v3850_v46 = vld [vmem:[%s3192_s15 + $0x988] sm:$0xff] }
 0x144   : > { %1865 = vmatpush.msra.mxu3 %v989_v48  ;;  %1794 = vmatpush.msrb.mxu1 %v753_v49  ;;  %v1381_v48 = vunpack.c.l.bf16 %v3842_v42  ;;  %v808_v49 = vunpack.c.h.bf16 %v3806_v21  ;;  %v1121_v53 = vunpack.c.l.bf16 %v3847_v45  ;;  %v1122_v10 = vunpack.c.h.bf16 %v3847_v45  ;;  %v3957_v45 = vld [vmem:[%s3192_s15 + $0x580] sm:$0xff] }
 0x145   : > { %1902 = vmatpush.msrb.mxu2 %v1068_v51  ;;  %1831 = vmatpush.msra.mxu0 %v832_v52  ;;  %v3857_v51 = vld [vmem:[%s3192_s15 + $0x578] sm:$0xff]  ;;  %v3860_v52 = vld [vmem:[%s3192_s15 + $0x920] sm:$0xff] }
 0x146   : > { %1795 = vmatmul.f32.vlgmr.msrb.gmra.mxu1 %v3358_v14  ;;  %1866 = vmatpush.msra.mxu3 %v963_v54  ;;  %v1355_v54 = vunpack.c.l.bf16 %v3850_v46  ;;  %v1329_v58 = vunpack.c.l.bf16 %v3860_v52 }
 0x147   : > { %1886 = vmatpush.msra.mxu1 %v1379_v56  ;;  %1903 = vmatpush.msrb.mxu2 %v1042_v57  ;;  %v1198_v56 = vunpack.c.h.bf16 %v3820_v28  ;;  %v1095_v57 = vunpack.c.l.bf16 %v3857_v51 }
 0x148   : > { %1832 = vmatpush.msra.mxu0 %v806_v60  ;;  %1867 = vmatpush.msra.mxu3 %v937_v61  ;;  %v3872_v60 = vld [vmem:[%s3192_s15 + $0x510] sm:$0xff]  ;;  %v3875_v61 = vld [vmem:[%s3192_s15 + $0x8b8] sm:$0xff] }
 0x149   : > { %1887 = vmatpush.msra.mxu1 %v1353_v63  ;;  %1904 = vmatpush.msrb.mxu2 %v1016_v0  ;;  %v1172_v63 = vunpack.c.h.bf16 %v3830_v34  ;;  %v3880_v0 = vld [vmem:[%s3192_s15 + $0x4a8] sm:$0xff]  ;;  %v3938_v34 = vld [vmem:[%s3192_s15 + $0x650] sm:$0xff] }
 0x14a   : > { %1833 = vmatpush.msra.mxu0 %v780_v2  ;;  %1868 = vmatpush.msra.mxu3 %v911_v3  ;;  %v1069_v2 = vunpack.c.l.bf16 %v3872_v60  ;;  %v1303_v3 = vunpack.c.l.bf16 %v3875_v61 }
 0x14b   : > { %1888 = vmatpush.msra.mxu1 %v1327_v5  ;;  %1905 = vmatpush.msrb.mxu2 %v990_v6  ;;  %v1382_v5 = vunpack.c.h.bf16 %v3842_v42  ;;  %v3890_v6 = vld [vmem:[%s3192_s15 + $0x440] sm:$0xff]  ;;  %v3952_v42 = vld [vmem:[%s3192_s15 + $0x1d0] sm:$0xff] }
 0x14c   : > { %1834 = vmatpush.msra.mxu0 %v754_v7  ;;  %1869 = vmatpush.msra.mxu3 %v885_v8  ;;  %v3893_v7 = vld [vmem:[%s3192_s15 + $0x7e8] sm:$0xff]  ;;  %v1043_v8 = vunpack.c.l.bf16 %v3880_v0  ;;  %v1017_v15 = vunpack.c.l.bf16 %v3890_v6 }
 0x14d   : > { %1835 = vmatmul.f32.vlgmr.msra.gmra.mxu0 %v3358_v14  ;;  %1889 = vmatpush.msra.mxu1 %v1301_v11  ;;  %v1356_v11 = vunpack.c.h.bf16 %v3850_v46  ;;  %v1251_v16 = vunpack.c.l.bf16 %v3893_v7 }
 0x14e   : > { %1906 = vmatpush.msrb.mxu2 %v964_v12  ;;  %1926 = vmatpush.msrb.mxu0 %v1380_v13  ;;  %v3903_v12 = vld [vmem:[%s3192_s15 + $0x3d8] sm:$0xff]  ;;  %v3906_v13 = vld [vmem:[%s3192_s15 + $0x780] sm:$0xff] }
 0x14f   : > { %1870 = vmatpush.msra.mxu3 %v859_v17  ;;  %1890 = vmatpush.msra.mxu1 %v1275_v18  ;;  %v1096_v17 = vunpack.c.h.bf16 %v3857_v51  ;;  %v1330_v18 = vunpack.c.h.bf16 %v3860_v52  ;;  %v991_v21 = vunpack.c.l.bf16 %v3903_v12  ;;  %v1225_v22 = vunpack.c.l.bf16 %v3906_v13  ;;  %v3969_v51 = vld [vmem:[%s3192_s15 + $0x518] sm:$0xff] }
 0x150   : > { %1907 = vmatpush.msrb.mxu2 %v938_v19  ;;  %1927 = vmatpush.msrb.mxu0 %v1354_v20  ;;  %v3913_v19 = vld [vmem:[%s3192_s15 + $0x370] sm:$0xff]  ;;  %v3916_v20 = vld [vmem:[%s3192_s15 + $0x718] sm:$0xff]  ;;  %v992_v41 = vunpack.c.h.bf16 %v3903_v12  ;;  %v1097_v52 = vunpack.c.l.bf16 %v3957_v45 }
 0x151   : > { %1871 = vmatpush.msra.mxu3 %v833_v23  ;;  %1891 = vmatpush.msra.mxu1 %v1249_v24  ;;  %v1070_v23 = vunpack.c.h.bf16 %v3872_v60  ;;  %v1304_v24 = vunpack.c.h.bf16 %v3875_v61  ;;  %v965_v27 = vunpack.c.l.bf16 %v3913_v19  ;;  %v1199_v28 = vunpack.c.l.bf16 %v3916_v20  ;;  %v4015_v12 = vld [vmem:[%s3192_s15 + $0x378] sm:$0xff] }
 0x152   : > { %1908 = vmatpush.msrb.mxu2 %v912_v25  ;;  %1928 = vmatpush.msrb.mxu0 %v1328_v26  ;;  %v3923_v25 = vld [vmem:[%s3192_s15 + $0x308] sm:$0xff]  ;;  %v3926_v26 = vld [vmem:[%s3192_s15 + $0x6b0] sm:$0xff]  ;;  %v1071_v60 = vunpack.c.l.bf16 %v3969_v51  ;;  %v1150_v61 = vunpack.c.h.bf16 %v3938_v34 }
 0x153   : > { %1872 = vmatpush.msra.mxu3 %v807_v29  ;;  %1892 = vmatpush.msra.mxu1 %v1223_v30  ;;  %v1044_v29 = vunpack.c.h.bf16 %v3880_v0  ;;  %v1278_v30 = vunpack.c.h.bf16 %v3883_v1  ;;  %v1173_v33 = vunpack.c.l.bf16 %v3926_v26  ;;  %v3994_v0 = vld [vmem:[%s3192_s15 + $0x98] sm:$0xff] }
 0x154   : > { %1909 = vmatpush.msrb.mxu2 %v886_v31  ;;  %1929 = vmatpush.msrb.mxu0 %v1302_v32  ;;  %v3933_v31 = vld [vmem:[%s3192_s15 + $0x2a0] sm:$0xff]  ;;  %v939_v32 = vunpack.c.l.bf16 %v3923_v25 }
 0x155   : > { %1873 = vmatpush.msra.mxu3 %v781_v35  ;;  %1893 = vmatpush.msra.mxu1 %v1197_v36  ;;  %v1018_v35 = vunpack.c.h.bf16 %v3890_v6  ;;  %v1252_v36 = vunpack.c.h.bf16 %v3893_v7  ;;  %v4004_v6 = vld [vmem:[%s3192_s15 + $0x30] sm:$0xff] }
 0x156   : > { %1910 = vmatpush.msrb.mxu2 %v860_v37  ;;  %1930 = vmatpush.msrb.mxu0 %v1276_v38  ;;  %v3943_v37 = vld [vmem:[%s3192_s15 + $0x238] sm:$0xff]  ;;  %v913_v38 = vunpack.c.l.bf16 %v3933_v31 }
 0x157   : > { %1874 = vmatpush.msra.mxu3 %v755_v39  ;;  %1894 = vmatpush.msra.mxu1 %v1171_v40  ;;  %v3947_v39 = vld [vmem:[%s3192_s15 + $0x5e8] sm:$0xff]  ;;  %v1149_v40 = vunpack.c.l.bf16 %v3938_v34 }
 0x158   : > { %1911 = vmatpush.msrb.mxu2 %v834_v43  ;;  %1931 = vmatpush.msrb.mxu0 %v1250_v44  ;;  %v1226_v43 = vunpack.c.h.bf16 %v3906_v13  ;;  %v887_v44 = vunpack.c.l.bf16 %v3943_v37  ;;  %v1123_v46 = vunpack.c.l.bf16 %v3947_v39  ;;  %v4021_v13 = vld [vmem:[%s4018_s24] sm:$0xff] }
 0x159   : > { %1875 = vmatmul.f32.vlgmr.msra.gmra.mxu3 %v3358_v14  ;;  %2724 = vmatmul.msk.f32.vlgmr.msra.gmra.mxu1 %vm1455_vm3, %v3328_v59  ;;  %v1403_v34 = vperm.slane %v4021_v13, 0 }
 0x15a   : > { %1939 = vmatpush.msrb.mxu1 %v1147_v47  ;;  %1966 = vmatpush.msrb.mxu3 %v1381_v48  ;;  %v966_v47 = vunpack.c.h.bf16 %v3913_v19  ;;  %v3962_v48 = vld [vmem:[%s3192_s15 + $0x168] sm:$0xff]  ;;  %v1072_v19 = vunpack.c.h.bf16 %v3969_v51 }
 0x15b   : > { %1912 = vmatpush.msrb.mxu2 %v808_v49  ;;  %1932 = vmatpush.msrb.mxu0 %v1224_v50  ;;  %v1200_v49 = vunpack.c.h.bf16 %v3916_v20  ;;  %v861_v50 = vunpack.c.l.bf16 %v3952_v42  ;;  %v836_v20 = vunpack.c.h.bf16 %v3962_v48 }
 0x15c   : > { %1940 = vmatpush.msrb.mxu1 %v1121_v53  ;;  %1967 = vmatpush.msrb.mxu3 %v1355_v54  ;;  %v940_v53 = vunpack.c.h.bf16 %v3923_v25  ;;  %v1174_v54 = vunpack.c.h.bf16 %v3926_v26  ;;  %v1404_v25 = vperm.slane %v4021_v13, 1  ;;  %v1405_v26 = vperm.slane %v4021_v13, 2 }
 0x15d   : > { %1913 = vmatpush.msrb.mxu2 %v782_v55  ;;  %1933 = vmatpush.msrb.mxu0 %v1198_v56  ;;  %v835_v55 = vunpack.c.l.bf16 %v3962_v48  ;;  %v3980_v56 = vld [vmem:[%s3192_s15 + $0x4b0] sm:$0xff]  ;;  %v4074_v48 = vld [vmem:[%s3192_s15 + $0x1d8] sm:$0xff] }
 0x15e   : > { %1941 = vmatpush.msrb.mxu1 %v1095_v57  ;;  %1968 = vmatpush.msrb.mxu3 %v1329_v58  ;;  %v3983_v57 = vld [vmem:[%s3192_s15 + $0x100] sm:$0xff]  ;;  %v1045_v1 = vunpack.c.l.bf16 %v3980_v56 }
 0x15f   : > { %1914 = vmatpush.msrb.mxu2 %v756_v62  ;;  %1934 = vmatpush.msrb.mxu0 %v1172_v63  ;;  %v914_v62 = vunpack.c.h.bf16 %v3933_v31  ;;  %v3991_v63 = vld [vmem:[%s3192_s15 + $0x448] sm:$0xff]  ;;  %v810_v31 = vunpack.c.h.bf16 %v3983_v57 }
 0x160   : > { %1915 = vmatmul.f32.vlgmr.msrb.gmra.mxu2 %v3358_v14  ;;  %2725 = vmatmul.msk.f32.vlgmr.msrb.gmra.mxu0 %vm1455_vm3, %v3328_v59  ;;  %v1019_v7 = vunpack.c.l.bf16 %v3991_v63 }
 0x161   : > { %1942 = vmatpush.msrb.mxu1 %v1069_v2  ;;  %1969 = vmatpush.msrb.mxu3 %v1303_v3  ;;  %v809_v2 = vunpack.c.l.bf16 %v3983_v57  ;;  %v1124_v3 = vunpack.c.h.bf16 %v3947_v39 }
 0x162   : > { %1979 = vmatpush.msra.mxu0 %v1148_v4  ;;  %2006 = vmatpush.msra.mxu2 %v1382_v5  ;;  %v888_v4 = vunpack.c.h.bf16 %v3943_v37  ;;  %v4001_v5 = vld [vmem:[%s3192_s15 + $0x3e0] sm:$0xff]  ;;  %v784_v37 = vunpack.c.h.bf16 %v3994_v0 }
 0x163   : > { %1943 = vmatpush.msrb.mxu1 %v1043_v8  ;;  %1970 = vmatpush.msrb.mxu3 %v1277_v9  ;;  %v783_v8 = vunpack.c.l.bf16 %v3994_v0  ;;  %v1098_v9 = vunpack.c.h.bf16 %v3957_v45  ;;  %v994_v45 = vunpack.c.h.bf16 %v4001_v5 }
 0x164   : > { %1980 = vmatpush.msra.mxu0 %v1122_v10  ;;  %2007 = vmatpush.msra.mxu2 %v1356_v11  ;;  %v862_v10 = vunpack.c.h.bf16 %v3952_v42 }
 0x165   : > { %1944 = vmatpush.msrb.mxu1 %v1017_v15  ;;  %1971 = vmatpush.msrb.mxu3 %v1251_v16  ;;  %v993_v16 = vunpack.c.l.bf16 %v4001_v5 }
 0x166   : > { %1981 = vmatpush.msra.mxu0 %v1096_v17  ;;  %2008 = vmatpush.msra.mxu2 %v1330_v18  ;;  %v757_v17 = vunpack.c.l.bf16 %v4004_v6  ;;  %v4026_v18 = vld [vmem:[%s3192_s15 + $0x9f8] sm:$0xff] }
 0x167   : > { %1945 = vmatpush.msrb.mxu1 %v991_v21  ;;  %1972 = vmatpush.msrb.mxu3 %v1225_v22  ;;  %v4032_v21 = vld [vmem:[%s3192_s15 + $0x310] sm:$0xff]  ;;  %v1384_v57 = vunpack.c.h.bf16 %v4026_v18 }
 0x168   : > { %1982 = vmatpush.msra.mxu0 %v1070_v23  ;;  %2009 = vmatpush.msra.mxu2 %v1304_v24  ;;  %v967_v23 = vunpack.c.l.bf16 %v4015_v12  ;;  %v4036_v24 = vld [vmem:[%s3192_s15 + $0x990] sm:$0xff] }
 0x169   : > { %1946 = vmatpush.msrb.mxu1 %v965_v27  ;;  %1973 = vmatpush.msrb.mxu3 %v1199_v28  ;;  %v4012_v11 = vpop.f32.mrf.mxu1  ;;  %v1383_v27 = vunpack.c.l.bf16 %v4026_v18  ;;  %v1046_v28 = vunpack.c.h.bf16 %v3980_v56 }
 0x16a   : > { %1983 = vmatpush.msra.mxu0 %v1044_v29  ;;  %2010 = vmatpush.msra.mxu2 %v1278_v30  ;;  %v4043_v29 = vld [vmem:[%s3192_s15 + $0x2a8] sm:$0xff] }
 0x16b   : > { %1947 = vmatpush.msrb.mxu1 %v939_v32  ;;  %1974 = vmatpush.msrb.mxu3 %v1173_v33  ;;  %v941_v32 = vunpack.c.l.bf16 %v4032_v21  ;;  %v4048_v33 = vld [vmem:[%s3192_s15 + $0x928] sm:$0xff] }
 0x16c   : > { %1984 = vmatpush.msra.mxu0 %v1018_v35  ;;  %2011 = vmatpush.msra.mxu2 %v1252_v36  ;;  %v1357_v35 = vunpack.c.l.bf16 %v4036_v24  ;;  %v1020_v36 = vunpack.c.h.bf16 %v3991_v63  ;;  %v863_v63 = vunpack.c.l.bf16 %v4074_v48 }
 0x16d   : > { %2726 = vmatmul.msk.f32.vlgmr.msrb.gmra.mxu3 %vm1455_vm3, %v3328_v59  ;;  %1948 = vmatpush.msrb.mxu1 %v913_v38  ;;  %v4061_v38 = vld [vmem:[%s3192_s15 + $0x240] sm:$0xff] }
 0x16e   : > { %2019 = vmatpush.msra.mxu3 %v1149_v40  ;;  %1985 = vmatpush.msra.mxu0 %v992_v41  ;;  %v915_v40 = vunpack.c.l.bf16 %v4043_v29  ;;  %v4066_v41 = vld [vmem:[%s3192_s15 + $0x8c0] sm:$0xff] }
 0x16f   : > { %2012 = vmatpush.msra.mxu2 %v1226_v43  ;;  %1949 = vmatpush.msrb.mxu1 %v887_v44  ;;  %v3985_v58 = vpop.f32.mrf.mxu3  ;;  %v1516_v22 = vpop.f32.mrf.mxu0  ;;  %v1406_v43 = vperm.slane %v4021_v13, 3  ;;  %v1331_v44 = vunpack.c.l.bf16 %v4048_v33 }
 0x170   : > { %2020 = vmatpush.msra.mxu3 %v1123_v46  ;;  %1986 = vmatpush.msra.mxu0 %v966_v47  ;;  %v1517_v39 = vadd.f32 %v1516_v22, %v1404_v25  ;;  %v758_v46 = vunpack.c.h.bf16 %v4004_v6  ;;  %v889_v47 = vunpack.c.l.bf16 %v4061_v38  ;;  %v4102_v6 = vld [vmem:[%s3192_s15 + $0x108] sm:$0xff]  ;;  %v1306_v22 = vunpack.c.h.bf16 %v4066_v41 }
 0x171   : > { %2013 = vmatpush.msra.mxu2 %v1200_v49  ;;  %1950 = vmatpush.msrb.mxu1 %v861_v50  ;;  %v4077_v49 = vld [vmem:[%s3192_s15 + $0x858] sm:$0xff]  ;;  %v811_v18 = vunpack.c.l.bf16 %v4102_v6 }
 0x172   : > { %2021 = vmatpush.msra.mxu3 %v1097_v52  ;;  %1987 = vmatpush.msra.mxu0 %v940_v53  ;;  %v1576_v51 = vpop.f32.mrf.mxu1  ;;  %v1305_v52 = vunpack.c.l.bf16 %v4066_v41  ;;  %v968_v53 = vunpack.c.h.bf16 %v4015_v12  ;;  %v1537_v56 = vadd.f32 %v4012_v11, %v1517_v39  ;;  %v1279_v0 = vunpack.c.l.bf16 %v4077_v49 }
 0x173   : > { %2014 = vmatpush.msra.mxu2 %v1174_v54  ;;  %1951 = vmatpush.msrb.mxu1 %v835_v55  ;;  %v4088_v54 = vld [vmem:[%s3192_s15 + $0x170] sm:$0xff]  ;;  %v1332_v11 = vunpack.c.h.bf16 %v4048_v33  ;;  %v4144_v33 = vld [vmem:[%s3192_s15 + $0x658] sm:$0xff]  ;;  %v812_v41 = vunpack.c.h.bf16 %v4102_v6 }
 0x174   : > { %2727 = vmatmul.msk.f32.vlgmr.msra.gmra.mxu2 %vm1455_vm3, %v3328_v59  ;;  %2022 = vmatpush.msra.mxu3 %v1071_v60  ;;  %v4093_v60 = vld [vmem:[%s3192_s15 + $0x7f0] sm:$0xff]  ;;  %v837_v5 = vunpack.c.l.bf16 %v4088_v54  ;;  %v1151_v39 = vunpack.c.l.bf16 %v4144_v33 }
 0x175   : > { %2059 = vmatpush.msrb.mxu2 %v1150_v61  ;;  %1988 = vmatpush.msra.mxu0 %v914_v62  ;;  %v1476_v15 = vpop.f32.mrf.mxu2  ;;  %v4211_v6 = vld [vmem:[%s3192_s15 + $0x790] sm:$0xff] }
 0x176   : > { %2023 = vmatpush.msra.mxu3 %v1045_v1  ;;  %1952 = vmatpush.msrb.mxu1 %v809_v2  ;;  %v1477_v50 = vadd.f32 %v1476_v15, %v1403_v34  ;;  %v942_v1 = vunpack.c.h.bf16 %v4032_v21  ;;  %v4113_v15 = vld [vmem:[%s3192_s15 + $0xa0] sm:$0xff]  ;;  %v890_v21 = vunpack.c.h.bf16 %v4061_v38  ;;  %v4155_v38 = vld [vmem:[%s3192_s15 + $0x998] sm:$0xff] }
 0x177   : > { %2060 = vmatpush.msrb.mxu2 %v1124_v3  ;;  %1989 = vmatpush.msra.mxu0 %v888_v4  ;;  %v1358_v3 = vunpack.c.h.bf16 %v4036_v24  ;;  %v4132_v24 = vld [vmem:[%s3192_s15 + $0x6b8] sm:$0xff]  ;;  %v4147_v34 = vld [vmem:[%s3192_s15 + $0xa00] sm:$0xff] }
 0x178   : > { %2024 = vmatpush.msra.mxu3 %v1019_v7  ;;  %1953 = vmatpush.msrb.mxu1 %v783_v8  ;;  %v1556_v30 = vpop.f32.mrf.mxu3  ;;  %v1497_v4 = vadd.f32 %v3985_v58, %v1477_v50  ;;  %v4105_v7 = vld [vmem:[%s3192_s15 + $0x788] sm:$0xff]  ;;  %v2525_v58 = vrot.slane %v1537_v56, 6  ;;  %v4188_v56 = vld [vmem:[%s3192_s15 + $0x860] sm:$0xff] }
 0x179   : > { %2061 = vmatpush.msrb.mxu2 %v1098_v9  ;;  %1990 = vmatpush.msra.mxu0 %v862_v10  ;;  %v1557_v42 = vadd.f32 %v1556_v30, %v1405_v26  ;;  %v1616_v2 = vpop.f32.mrf.mxu0  ;;  %v1253_v9 = vunpack.c.l.bf16 %v4093_v60  ;;  %v916_v10 = vunpack.c.h.bf16 %v4043_v29  ;;  %v785_v26 = vunpack.c.l.bf16 %v4113_v15 }
 0x17a   : > { %2025 = vmatpush.msra.mxu3 %v993_v16  ;;  %1954 = vmatpush.msrb.mxu1 %v757_v17  ;;  %v4116_v16 = vld [vmem:[%s3192_s15 + $0x720] sm:$0xff]  ;;  %v864_v29 = vunpack.c.h.bf16 %v4074_v48  ;;  %v1280_v30 = vunpack.c.h.bf16 %v4077_v49 }
 0x17b   : > { %2062 = vmatpush.msrb.mxu2 %v1072_v19  ;;  %1991 = vmatpush.msra.mxu0 %v836_v20  ;;  %v1577_v61 = vadd.f32 %v1576_v51, %v1557_v42  ;;  %v1227_v19 = vunpack.c.l.bf16 %v4105_v7  ;;  %v2544_v20 = vsel %vm345_vm0, %v1497_v4, %v2525_v58  ;;  %v1228_v42 = vunpack.c.h.bf16 %v4105_v7  ;;  %v4177_v51 = vld [vmem:[%s3192_s15 + $0x520] sm:$0xff]  ;;  %v4221_v58 = vld [vmem:[%s3192_s15 + $0x728] sm:$0xff] }
 0x17c   : > { %1955 = vmatmul.f32.vlgmr.msrb.gmra.mxu1 %v3358_v14  ;;  %2026 = vmatpush.msra.mxu3 %v967_v23  ;;  %v4129_v23 = vld [vmem:[%s3192_s15 + $0x38] sm:$0xff]  ;;  %v1202_v48 = vunpack.c.h.bf16 %v4116_v16  ;;  %v1360_v4 = vunpack.c.h.bf16 %v4155_v38 }
 0x17d   : > { %2046 = vmatpush.msra.mxu1 %v1383_v27  ;;  %2063 = vmatpush.msrb.mxu2 %v1046_v28  ;;  %v2526_v12 = vrot.slane %v1577_v61, 4  ;;  %v1201_v27 = vunpack.c.l.bf16 %v4116_v16  ;;  %v1152_v61 = vunpack.c.h.bf16 %v4144_v33  ;;  %v1074_v16 = vunpack.c.h.bf16 %v4177_v51  ;;  %v4254_v33 = vld [vmem:[%s3192_s15 + $0x5f8] sm:$0xff] }
 0x17e   : > { %1992 = vmatpush.msra.mxu0 %v810_v31  ;;  %2027 = vmatpush.msra.mxu3 %v941_v32  ;;  %v759_v31 = vunpack.c.l.bf16 %v4129_v23  ;;  %v1175_v32 = vunpack.c.l.bf16 %v4132_v24 }
 0x17f   : > { %2047 = vmatpush.msra.mxu1 %v1357_v35  ;;  %2064 = vmatpush.msrb.mxu2 %v1020_v36  ;;  %v1596_v55 = vpop.f32.mrf.mxu2  ;;  %v838_v35 = vunpack.c.h.bf16 %v4088_v54  ;;  %v1254_v36 = vunpack.c.h.bf16 %v4093_v60  ;;  %v1176_v54 = vunpack.c.h.bf16 %v4132_v24  ;;  %v4238_v24 = vld [vmem:[%s3192_s15 + $0x2b0] sm:$0xff] }
 0x180   : > { %1993 = vmatpush.msra.mxu0 %v784_v37  ;;  %2028 = vmatpush.msra.mxu3 %v915_v40  ;;  %v1597_v62 = vadd.f32 %v1596_v55, %v1406_v43  ;;  %v4152_v37 = vld [vmem:[%s3192_s15 + $0x5f0] sm:$0xff]  ;;  %v1385_v40 = vunpack.c.l.bf16 %v4147_v34  ;;  %v4162_v43 = vld [vmem:[%s3192_s15 + $0x588] sm:$0xff]  ;;  %v4185_v55 = vld [vmem:[%s3192_s15 + $0x4b8] sm:$0xff] }
 0x181   : > { %2048 = vmatpush.msra.mxu1 %v1331_v44  ;;  %2065 = vmatpush.msrb.mxu2 %v994_v45  ;;  %v4165_v44 = vld [vmem:[%s3192_s15 + $0x930] sm:$0xff]  ;;  %v1125_v45 = vunpack.c.l.bf16 %v4152_v37  ;;  %v1099_v49 = vunpack.c.l.bf16 %v4162_v43 }
 0x182   : > { %1994 = vmatpush.msra.mxu0 %v758_v46  ;;  %2029 = vmatpush.msra.mxu3 %v889_v47  ;;  %v1617_v8 = vadd.f32 %v1616_v2, %v1597_v62  ;;  %v1359_v46 = vunpack.c.l.bf16 %v4155_v38  ;;  %v786_v47 = vunpack.c.h.bf16 %v4113_v15  ;;  %v1333_v50 = vunpack.c.l.bf16 %v4165_v44 }
 0x183   : > { %1995 = vmatmul.f32.vlgmr.msra.gmra.mxu0 %v3358_v14  ;;  %2049 = vmatpush.msra.mxu1 %v1305_v52  ;;  %v4180_v52 = vld [vmem:[%s3192_s15 + $0x8c8] sm:$0xff]  ;;  %v1386_v62 = vunpack.c.h.bf16 %v4147_v34  ;;  %v1281_v2 = vunpack.c.l.bf16 %v4188_v56  ;;  %v1229_v15 = vunpack.c.l.bf16 %v4211_v6 }
 0x184   : > { %2066 = vmatpush.msrb.mxu2 %v968_v53  ;;  %2086 = vmatpush.msrb.mxu0 %v1384_v57  ;;  %v2527_v17 = vrot.slane %v1617_v8, 2  ;;  %v760_v53 = vunpack.c.h.bf16 %v4129_v23  ;;  %v1073_v57 = vunpack.c.l.bf16 %v4177_v51  ;;  %v1307_v60 = vunpack.c.l.bf16 %v4180_v52 }
 0x185   : > { %2030 = vmatpush.msra.mxu3 %v863_v63  ;;  %2050 = vmatpush.msra.mxu1 %v1279_v0  ;;  %v4195_v63 = vld [vmem:[%s3192_s15 + $0x450] sm:$0xff]  ;;  %v4198_v0 = vld [vmem:[%s3192_s15 + $0x7f8] sm:$0xff]  ;;  %v1282_v23 = vunpack.c.h.bf16 %v4188_v56 }
 0x186   : > { %2067 = vmatpush.msrb.mxu2 %v942_v1  ;;  %2087 = vmatpush.msrb.mxu0 %v1358_v3  ;;  %v2546_v25 = vsel %vm2545_vm5, %v2526_v12, %v2527_v17  ;;  %v1047_v1 = vunpack.c.l.bf16 %v4185_v55  ;;  %v1126_v3 = vunpack.c.h.bf16 %v4152_v37  ;;  %v1021_v7 = vunpack.c.l.bf16 %v4195_v63 }
 0x187   : > { %2031 = vmatpush.msra.mxu3 %v837_v5  ;;  %2051 = vmatpush.msra.mxu1 %v1253_v9  ;;  %v2548_v28 = vsel %vm2547_vm6, %v2544_v20, %v2546_v25  ;;  %v4208_v5 = vld [vmem:[%s3192_s15 + $0x3e8] sm:$0xff]  ;;  %v1255_v8 = vunpack.c.l.bf16 %v4198_v0  ;;  %v1100_v9 = vunpack.c.h.bf16 %v4162_v43  ;;  %v1308_v17 = vunpack.c.h.bf16 %v4180_v52 }
 0x188   : > { %2068 = vmatpush.msrb.mxu2 %v916_v10  ;;  %2088 = vmatpush.msrb.mxu0 %v1332_v11  ;;  %2572 = vst [vmem:[%s4123_s18] sm:$0xff] %v2548_v28  ;;  %v1334_v10 = vunpack.c.h.bf16 %v4165_v44  ;;  %v4218_v11 = vld [vmem:[%s3192_s15 + $0x380] sm:$0xff]  ;;  %v995_v12 = vunpack.c.l.bf16 %v4208_v5  ;;  %v1022_v28 = vunpack.c.h.bf16 %v4195_v63  ;;  %v1230_v37 = vunpack.c.h.bf16 %v4211_v6  ;;  %v4297_v63 = vld [vmem:[%s3192_s15 + $0xa8] sm:$0xff] }
 0x189   : > { %2032 = vmatpush.msra.mxu3 %v811_v18  ;;  %2052 = vmatpush.msra.mxu1 %v1227_v19  ;;  %v4228_v18 = vld [vmem:[%s3192_s15 + $0x318] sm:$0xff]  ;;  %v4231_v19 = vld [vmem:[%s3192_s15 + $0x6c0] sm:$0xff]  ;;  %v969_v20 = vunpack.c.l.bf16 %v4218_v11  ;;  %v1204_v43 = vunpack.c.h.bf16 %v4221_v58 }
 0x18a   : > { %2069 = vmatpush.msrb.mxu2 %v890_v21  ;;  %2089 = vmatpush.msrb.mxu0 %v1306_v22  ;;  %v1203_v21 = vunpack.c.l.bf16 %v4221_v58  ;;  %v1048_v22 = vunpack.c.h.bf16 %v4185_v55  ;;  %v943_v25 = vunpack.c.l.bf16 %v4228_v18  ;;  %v1178_v52 = vunpack.c.h.bf16 %v4231_v19  ;;  %v4287_v55 = vld [vmem:[%s3192_s15 + $0x110] sm:$0xff] }
 0x18b   : > { %2033 = vmatpush.msra.mxu3 %v785_v26  ;;  %2053 = vmatpush.msra.mxu1 %v1201_v27  ;;  %v1177_v26 = vunpack.c.l.bf16 %v4231_v19  ;;  %v4243_v27 = vld [vmem:[%s3192_s15 + $0x660] sm:$0xff]  ;;  %v1410_v58 = vperm.slane %v4021_v13, 7 }
 0x18c   : > { %2070 = vmatpush.msrb.mxu2 %v864_v29  ;;  %2090 = vmatpush.msrb.mxu0 %v1280_v30  ;;  %v1256_v29 = vunpack.c.h.bf16 %v4198_v0  ;;  %v4248_v30 = vld [vmem:[%s3192_s15 + $0x248] sm:$0xff]  ;;  %v1153_v34 = vunpack.c.l.bf16 %v4243_v27 }
 0x18d   : > { %2034 = vmatpush.msra.mxu3 %v759_v31  ;;  %2054 = vmatpush.msra.mxu1 %v1175_v32  ;;  %v4250_v31 = vpop.f32.mrf.mxu3  ;;  %v917_v32 = vunpack.c.l.bf16 %v4238_v24  ;;  %v891_v38 = vunpack.c.l.bf16 %v4248_v30  ;;  %v892_v6 = vunpack.c.h.bf16 %v4248_v30 }
 0x18e   : > { %2071 = vmatpush.msrb.mxu2 %v838_v35  ;;  %2091 = vmatpush.msrb.mxu0 %v1254_v36  ;;  %v996_v35 = vunpack.c.h.bf16 %v4208_v5  ;;  %v4259_v36 = vld [vmem:[%s3192_s15 + $0x1e0] sm:$0xff]  ;;  %v1128_v5 = vunpack.c.h.bf16 %v4254_v33 }
 0x18f   : > { %2035 = vmatmul.f32.vlgmr.msra.gmra.mxu3 %v3358_v14  ;;  %2728 = vmatmul.msk.f32.vlgmr.msra.gmra.mxu1 %vm1455_vm3, %v3328_v59  ;;  %v865_v44 = vunpack.c.l.bf16 %v4259_v36 }
 0x190   : > { %2099 = vmatpush.msrb.mxu1 %v1151_v39  ;;  %2126 = vmatpush.msrb.mxu3 %v1385_v40  ;;  %v4264_v39 = vld [vmem:[%s3192_s15 + $0x590] sm:$0xff]  ;;  %v1127_v40 = vunpack.c.l.bf16 %v4254_v33 }
 0x191   : > { %2072 = vmatpush.msrb.mxu2 %v812_v41  ;;  %2092 = vmatpush.msrb.mxu0 %v1228_v42  ;;  %v970_v41 = vunpack.c.h.bf16 %v4218_v11  ;;  %v4269_v42 = vld [vmem:[%s3192_s15 + $0x178] sm:$0xff] }
 0x192   : > { %2100 = vmatpush.msrb.mxu1 %v1125_v45  ;;  %2127 = vmatpush.msrb.mxu3 %v1359_v46  ;;  %v4276_v45 = vld [vmem:[%s3192_s15 + $0x528] sm:$0xff]  ;;  %v1696_v46 = vpop.f32.mrf.mxu2 }
 0x193   : > { %2073 = vmatpush.msrb.mxu2 %v786_v47  ;;  %2093 = vmatpush.msrb.mxu0 %v1202_v48  ;;  %v1408_v47 = vperm.slane %v4021_v13, 5  ;;  %v1101_v48 = vunpack.c.l.bf16 %v4264_v39  ;;  %v1075_v56 = vunpack.c.l.bf16 %v4276_v45 }
 0x194   : > { %2101 = vmatpush.msrb.mxu1 %v1099_v49  ;;  %2128 = vmatpush.msrb.mxu3 %v1333_v50  ;;  %v944_v49 = vunpack.c.h.bf16 %v4228_v18  ;;  %v1636_v50 = vpop.f32.mrf.mxu1  ;;  %v1676_v51 = vpop.f32.mrf.mxu0 }
 0x195   : > { %2074 = vmatpush.msrb.mxu2 %v760_v53  ;;  %2094 = vmatpush.msrb.mxu0 %v1176_v54  ;;  %v839_v53 = vunpack.c.l.bf16 %v4269_v42  ;;  %v4284_v54 = vld [vmem:[%s3192_s15 + $0x4c0] sm:$0xff] }
 0x196   : > { %2075 = vmatmul.f32.vlgmr.msrb.gmra.mxu2 %v3358_v14  ;;  %2729 = vmatmul.msk.f32.vlgmr.msrb.gmra.mxu0 %vm1455_vm3, %v3328_v59 }
 0x197   : > { %2102 = vmatpush.msrb.mxu1 %v1073_v57  ;;  %2129 = vmatpush.msrb.mxu3 %v1307_v60  ;;  %v1409_v57 = vperm.slane %v4021_v13, 6  ;;  %v1154_v60 = vunpack.c.h.bf16 %v4243_v27  ;;  %v4332_v27 = vld [vmem:[%s3192_s15 + $0x9a0] sm:$0xff] }
 0x198   : > { %2139 = vmatpush.msra.mxu0 %v1152_v61  ;;  %2166 = vmatpush.msra.mxu2 %v1386_v62  ;;  %v918_v61 = vunpack.c.h.bf16 %v4238_v24  ;;  %v4294_v62 = vld [vmem:[%s3192_s15 + $0x458] sm:$0xff]  ;;  %v4328_v24 = vld [vmem:[%s3192_s15 + $0x320] sm:$0xff] }
 0x199   : > { %2103 = vmatpush.msrb.mxu1 %v1047_v1  ;;  %2130 = vmatpush.msrb.mxu3 %v1281_v2  ;;  %v1677_v1 = vadd.f32 %v1676_v51, %v1408_v47  ;;  %v1049_v2 = vunpack.c.l.bf16 %v4284_v54  ;;  %v4354_v47 = vld [vmem:[%s3192_s15 + $0x8d0] sm:$0xff] }
 0x19a   : > { %2140 = vmatpush.msra.mxu0 %v1126_v3  ;;  %2167 = vmatpush.msra.mxu2 %v1360_v4  ;;  %v813_v3 = vunpack.c.l.bf16 %v4287_v55  ;;  %v1407_v4 = vperm.slane %v4021_v13, 4 }
 0x19b   : > { %2104 = vmatpush.msrb.mxu1 %v1021_v7  ;;  %2131 = vmatpush.msrb.mxu3 %v1255_v8  ;;  %v4305_v7 = vld [vmem:[%s3192_s15 + $0x3f0] sm:$0xff]  ;;  %v4308_v8 = vld [vmem:[%s3192_s15 + $0x40] sm:$0xff] }
 0x19c   : > { %2141 = vmatpush.msra.mxu0 %v1100_v9  ;;  %2168 = vmatpush.msra.mxu2 %v1334_v10  ;;  %v1023_v9 = vunpack.c.l.bf16 %v4294_v62  ;;  %v787_v10 = vunpack.c.l.bf16 %v4297_v63  ;;  %v997_v18 = vunpack.c.l.bf16 %v4305_v7  ;;  %v761_v19 = vunpack.c.l.bf16 %v4308_v8 }
 0x19d   : > { %2105 = vmatpush.msrb.mxu1 %v995_v12  ;;  %2132 = vmatpush.msrb.mxu3 %v1229_v15  ;;  %v1102_v12 = vunpack.c.h.bf16 %v4264_v39  ;;  %v866_v15 = vunpack.c.h.bf16 %v4259_v36  ;;  %v1637_v13 = vadd.f32 %v1636_v50, %v1407_v4  ;;  %v814_v36 = vunpack.c.h.bf16 %v4287_v55  ;;  %v4384_v4 = vld [vmem:[%s3192_s15 + $0x118] sm:$0xff] }
 0x19e   : > { %2142 = vmatpush.msra.mxu0 %v1074_v16  ;;  %2169 = vmatpush.msra.mxu2 %v1308_v17  ;;  %v4318_v16 = vld [vmem:[%s3192_s15 + $0x388] sm:$0xff]  ;;  %v1697_v17 = vadd.f32 %v1696_v46, %v1677_v1  ;;  %v762_v51 = vunpack.c.h.bf16 %v4308_v8 }
 0x19f   : > { %2106 = vmatpush.msrb.mxu1 %v969_v20  ;;  %2133 = vmatpush.msrb.mxu3 %v1203_v21  ;;  %v4323_v20 = vld [vmem:[%s3192_s15 + $0xa08] sm:$0xff] }
 0x1a0   : > { %2143 = vmatpush.msra.mxu0 %v1048_v22  ;;  %2170 = vmatpush.msra.mxu2 %v1282_v23  ;;  %v1736_v21 = vpop.f32.mrf.mxu1  ;;  %v1076_v22 = vunpack.c.h.bf16 %v4276_v45  ;;  %v840_v23 = vunpack.c.h.bf16 %v4269_v42  ;;  %v1387_v30 = vunpack.c.l.bf16 %v4323_v20  ;;  %v1024_v42 = vunpack.c.h.bf16 %v4294_v62  ;;  %v4374_v62 = vld [vmem:[%s3192_s15 + $0x180] sm:$0xff] }
 0x1a1   : > { %2107 = vmatpush.msrb.mxu1 %v943_v25  ;;  %2134 = vmatpush.msrb.mxu3 %v1177_v26  ;;  %v971_v26 = vunpack.c.l.bf16 %v4318_v16 }
 0x1a2   : > { %2144 = vmatpush.msra.mxu0 %v1022_v28  ;;  %2171 = vmatpush.msra.mxu2 %v1256_v29 }
 0x1a3   : > { %2730 = vmatmul.msk.f32.vlgmr.msrb.gmra.mxu3 %vm1455_vm3, %v3328_v59  ;;  %2108 = vmatpush.msrb.mxu1 %v917_v32  ;;  %v1050_v32 = vunpack.c.h.bf16 %v4284_v54  ;;  %v4365_v54 = vld [vmem:[%s3192_s15 + $0x868] sm:$0xff] }
 0x1a4   : > { %2179 = vmatpush.msra.mxu3 %v1153_v34  ;;  %2145 = vmatpush.msra.mxu0 %v996_v35  ;;  %v4337_v34 = vld [vmem:[%s3192_s15 + $0x2b8] sm:$0xff]  ;;  %v2528_v35 = vrot.slane %v1697_v17, 6  ;;  %v1283_v1 = vunpack.c.l.bf16 %v4365_v54  ;;  %v4405_v17 = vld [vmem:[%s3192_s15 + $0x48] sm:$0xff] }
 0x1a5   : > { %2172 = vmatpush.msra.mxu2 %v1230_v37  ;;  %2109 = vmatpush.msrb.mxu1 %v891_v38  ;;  %v945_v37 = vunpack.c.l.bf16 %v4328_v24  ;;  %v4342_v38 = vld [vmem:[%s3192_s15 + $0x938] sm:$0xff]  ;;  %v919_v46 = vunpack.c.l.bf16 %v4337_v34  ;;  %v920_v8 = vunpack.c.h.bf16 %v4337_v34 }
 0x1a6   : > { %2180 = vmatpush.msra.mxu3 %v1127_v40  ;;  %2146 = vmatpush.msra.mxu0 %v970_v41  ;;  %v1716_v0 = vpop.f32.mrf.mxu3  ;;  %v1657_v40 = vadd.f32 %v4250_v31, %v1637_v13  ;;  %v1361_v41 = vunpack.c.l.bf16 %v4332_v27 }
 0x1a7   : > { %2173 = vmatpush.msra.mxu2 %v1204_v43  ;;  %2110 = vmatpush.msrb.mxu1 %v865_v44  ;;  %v1717_v11 = vadd.f32 %v1716_v0, %v1409_v57  ;;  %v1776_v33 = vpop.f32.mrf.mxu0  ;;  %v4348_v43 = vld [vmem:[%s3192_s15 + $0x250] sm:$0xff]  ;;  %v788_v44 = vunpack.c.h.bf16 %v4297_v63  ;;  %v4377_v63 = vld [vmem:[%s3192_s15 + $0x800] sm:$0xff] }
 0x1a8   : > { %2181 = vmatpush.msra.mxu3 %v1101_v48  ;;  %2147 = vmatpush.msra.mxu0 %v944_v49  ;;  %v1335_v48 = vunpack.c.l.bf16 %v4342_v38  ;;  %v998_v49 = vunpack.c.h.bf16 %v4305_v7  ;;  %v2549_v50 = vsel %vm345_vm0, %v1657_v40, %v2528_v35  ;;  %v1257_v7 = vunpack.c.l.bf16 %v4377_v63  ;;  %v4435_v35 = vld [vmem:[%s3192_s15 + $0x598] sm:$0xff] }
 0x1a9   : > { %2174 = vmatpush.msra.mxu2 %v1178_v52  ;;  %2111 = vmatpush.msrb.mxu1 %v839_v53  ;;  %v1737_v28 = vadd.f32 %v1736_v21, %v1717_v11  ;;  %v893_v52 = vunpack.c.l.bf16 %v4348_v43  ;;  %v4362_v53 = vld [vmem:[%s3192_s15 + $0x1e8] sm:$0xff]  ;;  %v4398_v11 = vld [vmem:[%s3192_s15 + $0x730] sm:$0xff]  ;;  %v1284_v21 = vunpack.c.h.bf16 %v4365_v54 }
 0x1aa   : > { %2731 = vmatmul.msk.f32.vlgmr.msra.gmra.mxu2 %vm1455_vm3, %v3328_v59  ;;  %2182 = vmatpush.msra.mxu3 %v1075_v56  ;;  %v1309_v56 = vunpack.c.l.bf16 %v4354_v47  ;;  %v867_v0 = vunpack.c.l.bf16 %v4362_v53  ;;  %v868_v13 = vunpack.c.h.bf16 %v4362_v53  ;;  %v1206_v40 = vunpack.c.h.bf16 %v4398_v11  ;;  %v4471_v53 = vld [vmem:[%s3192_s15 + $0x808] sm:$0xff] }
 0x1ab   : > { %2219 = vmatpush.msrb.mxu2 %v1154_v60  ;;  %2148 = vmatpush.msra.mxu0 %v918_v61  ;;  %v2529_v45 = vrot.slane %v1737_v28, 4  ;;  %v972_v60 = vunpack.c.h.bf16 %v4318_v16  ;;  %v1388_v61 = vunpack.c.h.bf16 %v4323_v20  ;;  %v1310_v16 = vunpack.c.h.bf16 %v4354_v47  ;;  %v4425_v28 = vld [vmem:[%s3192_s15 + $0x600] sm:$0xff]  ;;  %v4458_v47 = vld [vmem:[%s3192_s15 + $0x4c8] sm:$0xff] }
 0x1ac   : > { %2183 = vmatpush.msra.mxu3 %v1049_v2  ;;  %2112 = vmatpush.msrb.mxu1 %v813_v3  ;;  %v946_v2 = vunpack.c.h.bf16 %v4328_v24  ;;  %v1362_v3 = vunpack.c.h.bf16 %v4332_v27  ;;  %v1205_v20 = vunpack.c.l.bf16 %v4398_v11  ;;  %v4417_v24 = vld [vmem:[%s3192_s15 + $0x668] sm:$0xff]  ;;  %v1258_v27 = vunpack.c.h.bf16 %v4377_v63 }
 0x1ad   : > { %2220 = vmatpush.msrb.mxu2 %v1128_v5  ;;  %2149 = vmatpush.msra.mxu0 %v892_v6  ;;  %v1756_v25 = vpop.f32.mrf.mxu2  ;;  %v4387_v5 = vld [vmem:[%s3192_s15 + $0x798] sm:$0xff]  ;;  %v841_v6 = vunpack.c.l.bf16 %v4374_v62  ;;  %v1051_v54 = vunpack.c.l.bf16 %v4458_v47  ;;  %v1259_v63 = vunpack.c.l.bf16 %v4471_v53 }
 0x1ae   : > { %2184 = vmatpush.msra.mxu3 %v1023_v9  ;;  %2113 = vmatpush.msrb.mxu1 %v787_v10  ;;  %v1757_v29 = vadd.f32 %v1756_v25, %v1410_v58  ;;  %v1336_v9 = vunpack.c.h.bf16 %v4342_v38  ;;  %v4395_v10 = vld [vmem:[%s3192_s15 + $0xb0] sm:$0xff]  ;;  %v815_v58 = vunpack.c.l.bf16 %v4384_v4  ;;  %v1232_v34 = vunpack.c.h.bf16 %v4387_v5 }
 0x1af   : > { %2221 = vmatpush.msrb.mxu2 %v1102_v12  ;;  %2150 = vmatpush.msra.mxu0 %v866_v15  ;;  %v1231_v12 = vunpack.c.l.bf16 %v4387_v5  ;;  %v894_v15 = vunpack.c.h.bf16 %v4348_v43  ;;  %v4420_v25 = vld [vmem:[%s3192_s15 + $0xa10] sm:$0xff] }
 0x1b0   : > { %2185 = vmatpush.msra.mxu3 %v997_v18  ;;  %2114 = vmatpush.msrb.mxu1 %v761_v19  ;;  %v1777_v39 = vadd.f32 %v1776_v33, %v1757_v29  ;;  %v4408_v18 = vld [vmem:[%s3192_s15 + $0x6c8] sm:$0xff]  ;;  %v789_v19 = vunpack.c.l.bf16 %v4395_v10  ;;  %v816_v33 = vunpack.c.h.bf16 %v4384_v4  ;;  %v4450_v43 = vld [vmem:[%s3192_s15 + $0x530] sm:$0xff] }
 0x1b1   : > { %2222 = vmatpush.msrb.mxu2 %v1076_v22  ;;  %2151 = vmatpush.msra.mxu0 %v840_v23  ;;  %v763_v22 = vunpack.c.l.bf16 %v4405_v17  ;;  %v1179_v23 = vunpack.c.l.bf16 %v4408_v18  ;;  %v4428_v29 = vld [vmem:[%s3192_s15 + $0x9a8] sm:$0xff] }
 0x1b2   : > { %2115 = vmatmul.f32.vlgmr.msrb.gmra.mxu1 %v3358_v14  ;;  %2186 = vmatpush.msra.mxu3 %v971_v26  ;;  %v2530_v31 = vrot.slane %v1777_v39, 2  ;;  %v842_v26 = vunpack.c.h.bf16 %v4374_v62  ;;  %v1363_v38 = vunpack.c.l.bf16 %v4428_v29  ;;  %v790_v39 = vunpack.c.h.bf16 %v4395_v10 }
 0x1b3   : > { %2206 = vmatpush.msra.mxu1 %v1387_v30  ;;  %2223 = vmatpush.msrb.mxu2 %v1050_v32  ;;  %v1155_v30 = vunpack.c.l.bf16 %v4417_v24  ;;  %v1389_v32 = vunpack.c.l.bf16 %v4420_v25 }
 0x1b4   : > { %2152 = vmatpush.msra.mxu0 %v814_v36  ;;  %2187 = vmatpush.msra.mxu3 %v945_v37  ;;  %v2550_v55 = vsel %vm2545_vm5, %v2529_v45, %v2530_v31  ;;  %v4438_v36 = vld [vmem:[%s3192_s15 + $0x940] sm:$0xff]  ;;  %v1129_v37 = vunpack.c.l.bf16 %v4425_v28  ;;  %v764_v45 = vunpack.c.h.bf16 %v4405_v17  ;;  %v4461_v31 = vld [vmem:[%s3192_s15 + $0x870] sm:$0xff] }
 0x1b5   : > { %2207 = vmatpush.msra.mxu1 %v1361_v41  ;;  %2224 = vmatpush.msrb.mxu2 %v1024_v42  ;;  %v2551_v57 = vsel %vm2547_vm6, %v2549_v50, %v2550_v55  ;;  %v1103_v41 = vunpack.c.l.bf16 %v4435_v35  ;;  %v1337_v42 = vunpack.c.l.bf16 %v4438_v36  ;;  %v1156_v50 = vunpack.c.h.bf16 %v4417_v24 }
 0x1b6   : > { %2153 = vmatpush.msra.mxu0 %v788_v44  ;;  %2188 = vmatpush.msra.mxu3 %v919_v46  ;;  %2573 = vst [vmem:[%s4123_s18 + $0x8] sm:$0xff] %v2551_v57  ;;  %v4453_v44 = vld [vmem:[%s3192_s15 + $0x8d8] sm:$0xff]  ;;  %v1180_v46 = vunpack.c.h.bf16 %v4408_v18  ;;  %v1285_v55 = vunpack.c.l.bf16 %v4461_v31  ;;  %v1364_v57 = vunpack.c.h.bf16 %v4428_v29  ;;  %v4516_v18 = vld [vmem:[%s3192_s15 + $0x670] sm:$0xff]  ;;  %v4537_v29 = vld [vmem:[%s3192_s15 + $0x5a0] sm:$0xff] }
 0x1b7   : > { %2208 = vmatpush.msra.mxu1 %v1335_v48  ;;  %2225 = vmatpush.msrb.mxu2 %v998_v49  ;;  %v1077_v48 = vunpack.c.l.bf16 %v4450_v43  ;;  %v1311_v49 = vunpack.c.l.bf16 %v4453_v44  ;;  %v1157_v24 = vunpack.c.l.bf16 %v4516_v18 }
 0x1b8   : > { %2154 = vmatpush.msra.mxu0 %v762_v51  ;;  %2189 = vmatpush.msra.mxu3 %v893_v52  ;;  %v1390_v51 = vunpack.c.h.bf16 %v4420_v25  ;;  %v4468_v52 = vld [vmem:[%s3192_s15 + $0x460] sm:$0xff] }
 0x1b9   : > { %2155 = vmatmul.f32.vlgmr.msra.gmra.mxu0 %v3358_v14  ;;  %2209 = vmatpush.msra.mxu1 %v1309_v56  ;;  %v1130_v56 = vunpack.c.h.bf16 %v4425_v28  ;;  %v1025_v62 = vunpack.c.l.bf16 %v4468_v52 }
 0x1ba   : > { %2226 = vmatpush.msrb.mxu2 %v972_v60  ;;  %2246 = vmatpush.msrb.mxu0 %v1388_v61  ;;  %v4481_v60 = vld [vmem:[%s3192_s15 + $0x3f8] sm:$0xff]  ;;  %v4484_v61 = vld [vmem:[%s3192_s15 + $0x7a0] sm:$0xff] }
 0x1bb   : > { %2190 = vmatpush.msra.mxu3 %v867_v0  ;;  %2210 = vmatpush.msra.mxu1 %v1283_v1  ;;  %v1104_v0 = vunpack.c.h.bf16 %v4435_v35  ;;  %v1338_v1 = vunpack.c.h.bf16 %v4438_v36  ;;  %v999_v4 = vunpack.c.l.bf16 %v4481_v60  ;;  %v1233_v5 = vunpack.c.l.bf16 %v4484_v61 }
 0x1bc   : > { %2227 = vmatpush.msrb.mxu2 %v946_v2  ;;  %2247 = vmatpush.msrb.mxu0 %v1362_v3  ;;  %v4491_v2 = vld [vmem:[%s3192_s15 + $0x390] sm:$0xff]  ;;  %v4494_v3 = vld [vmem:[%s3192_s15 + $0x738] sm:$0xff]  ;;  %v1000_v25 = vunpack.c.h.bf16 %v4481_v60 }
 0x1bd   : > { %2191 = vmatpush.msra.mxu3 %v841_v6  ;;  %2211 = vmatpush.msra.mxu1 %v1257_v7  ;;  %v1078_v6 = vunpack.c.h.bf16 %v4450_v43  ;;  %v1312_v7 = vunpack.c.h.bf16 %v4453_v44  ;;  %v973_v10 = vunpack.c.l.bf16 %v4491_v2  ;;  %v1207_v11 = vunpack.c.l.bf16 %v4494_v3 }
 0x1be   : > { %2228 = vmatpush.msrb.mxu2 %v920_v8  ;;  %2248 = vmatpush.msrb.mxu0 %v1336_v9  ;;  %v4501_v8 = vld [vmem:[%s3192_s15 + $0x328] sm:$0xff]  ;;  %v4504_v9 = vld [vmem:[%s3192_s15 + $0x6d0] sm:$0xff]  ;;  %v1208_v35 = vunpack.c.h.bf16 %v4494_v3 }
 0x1bf   : > { %2192 = vmatpush.msra.mxu3 %v815_v58  ;;  %2212 = vmatpush.msra.mxu1 %v1231_v12  ;;  %v1052_v58 = vunpack.c.h.bf16 %v4458_v47  ;;  %v1286_v12 = vunpack.c.h.bf16 %v4461_v31  ;;  %v1181_v17 = vunpack.c.l.bf16 %v4504_v9  ;;  %v1182_v44 = vunpack.c.h.bf16 %v4504_v9  ;;  %v4563_v47 = vld [vmem:[%s3192_s15 + $0x120] sm:$0xff] }
 0x1c0   : > { %2229 = vmatpush.msrb.mxu2 %v894_v15  ;;  %2249 = vmatpush.msrb.mxu0 %v1310_v16  ;;  %v4511_v15 = vld [vmem:[%s3192_s15 + $0x2c0] sm:$0xff]  ;;  %v947_v16 = vunpack.c.l.bf16 %v4501_v8 }
 0x1c1   : > { %2193 = vmatpush.msra.mxu3 %v789_v19  ;;  %2213 = vmatpush.msra.mxu1 %v1205_v20  ;;  %v1026_v19 = vunpack.c.h.bf16 %v4468_v52  ;;  %v1260_v20 = vunpack.c.h.bf16 %v4471_v53  ;;  %v4573_v52 = vld [vmem:[%s3192_s15 + $0xb8] sm:$0xff] }
 0x1c2   : > { %2230 = vmatpush.msrb.mxu2 %v868_v13  ;;  %2250 = vmatpush.msrb.mxu0 %v1284_v21  ;;  %v4521_v13 = vld [vmem:[%s3192_s15 + $0x258] sm:$0xff]  ;;  %v4523_v21 = vpop.f32.mrf.mxu3 }
 0x1c3   : > { %2194 = vmatpush.msra.mxu3 %v763_v22  ;;  %2214 = vmatpush.msra.mxu1 %v1179_v23  ;;  %v921_v22 = vunpack.c.l.bf16 %v4511_v15  ;;  %v4527_v23 = vld [vmem:[%s3192_s15 + $0x608] sm:$0xff]  ;;  %v895_v28 = vunpack.c.l.bf16 %v4521_v13 }
 0x1c4   : > { %2231 = vmatpush.msrb.mxu2 %v842_v26  ;;  %2251 = vmatpush.msrb.mxu0 %v1258_v27  ;;  %v4532_v26 = vld [vmem:[%s3192_s15 + $0x1f0] sm:$0xff]  ;;  %v1234_v27 = vunpack.c.h.bf16 %v4484_v61  ;;  %v1132_v60 = vunpack.c.h.bf16 %v4527_v23  ;;  %v896_v61 = vunpack.c.h.bf16 %v4521_v13 }
 0x1c5   : > { %2195 = vmatmul.f32.vlgmr.msra.gmra.mxu3 %v3358_v14  ;;  %2732 = vmatmul.msk.f32.vlgmr.msra.gmra.mxu1 %vm1455_vm3, %v3328_v59  ;;  %v869_v36 = vunpack.c.l.bf16 %v4532_v26 }
 0x1c6   : > { %2259 = vmatpush.msrb.mxu1 %v1155_v30  ;;  %2286 = vmatpush.msrb.mxu3 %v1389_v32  ;;  %v1131_v30 = vunpack.c.l.bf16 %v4527_v23  ;;  %v974_v32 = vunpack.c.h.bf16 %v4491_v2 }
 0x1c7   : > { %2232 = vmatpush.msrb.mxu2 %v816_v33  ;;  %2252 = vmatpush.msrb.mxu0 %v1232_v34  ;;  %v4542_v33 = vld [vmem:[%s3192_s15 + $0x188] sm:$0xff] }
 0x1c8   : > { %2260 = vmatpush.msrb.mxu1 %v1129_v37  ;;  %2287 = vmatpush.msrb.mxu3 %v1363_v38  ;;  %v4545_v34 = vld [vmem:[%s4018_s24 + $0x8] sm:$0xff]  ;;  %v1856_v38 = vpop.f32.mrf.mxu2 }
 0x1c9   : > { %2233 = vmatpush.msrb.mxu2 %v790_v39  ;;  %2253 = vmatpush.msrb.mxu0 %v1206_v40  ;;  %v4552_v37 = vld [vmem:[%s3192_s15 + $0x538] sm:$0xff]  ;;  %v1412_v39 = vperm.slane %v4545_v34, 1  ;;  %v1105_v40 = vunpack.c.l.bf16 %v4537_v29  ;;  %v1414_v3 = vperm.slane %v4545_v34, 3 }
 0x1ca   : > { %2261 = vmatpush.msrb.mxu1 %v1103_v41  ;;  %2288 = vmatpush.msrb.mxu3 %v1337_v42  ;;  %v948_v41 = vunpack.c.h.bf16 %v4501_v8  ;;  %v1796_v42 = vpop.f32.mrf.mxu1  ;;  %v1836_v43 = vpop.f32.mrf.mxu0  ;;  %v1079_v31 = vunpack.c.l.bf16 %v4552_v37 }
 0x1cb   : > { %2234 = vmatpush.msrb.mxu2 %v764_v45  ;;  %2254 = vmatpush.msrb.mxu0 %v1180_v46  ;;  %v843_v45 = vunpack.c.l.bf16 %v4542_v33  ;;  %v4560_v46 = vld [vmem:[%s3192_s15 + $0x4d0] sm:$0xff] }
 0x1cc   : > { %2235 = vmatmul.f32.vlgmr.msrb.gmra.mxu2 %v3358_v14  ;;  %2733 = vmatmul.msk.f32.vlgmr.msrb.gmra.mxu0 %vm1455_vm3, %v3328_v59  ;;  %v1054_v23 = vunpack.c.h.bf16 %v4560_v46 }
 0x1cd   : > { %2262 = vmatpush.msrb.mxu1 %v1077_v48  ;;  %2289 = vmatpush.msrb.mxu3 %v1311_v49  ;;  %v1413_v48 = vperm.slane %v4545_v34, 2  ;;  %v1158_v49 = vunpack.c.h.bf16 %v4516_v18 }
 0x1ce   : > { %2299 = vmatpush.msra.mxu0 %v1156_v50  ;;  %2326 = vmatpush.msra.mxu2 %v1390_v51  ;;  %v922_v50 = vunpack.c.h.bf16 %v4511_v15  ;;  %v4570_v51 = vld [vmem:[%s3192_s15 + $0x468] sm:$0xff]  ;;  %v844_v15 = vunpack.c.h.bf16 %v4542_v33 }
 0x1cf   : > { %2263 = vmatpush.msrb.mxu1 %v1051_v54  ;;  %2290 = vmatpush.msrb.mxu3 %v1285_v55  ;;  %v1837_v54 = vadd.f32 %v1836_v43, %v1412_v39  ;;  %v1053_v55 = vunpack.c.l.bf16 %v4560_v46  ;;  %v4638_v46 = vld [vmem:[%s3192_s15 + $0x1f8] sm:$0xff] }
 0x1d0   : > { %2300 = vmatpush.msra.mxu0 %v1130_v56  ;;  %2327 = vmatpush.msra.mxu2 %v1364_v57  ;;  %v817_v56 = vunpack.c.l.bf16 %v4563_v47  ;;  %v1411_v57 = vperm.slane %v4545_v34, 0 }
 0x1d1   : > { %2264 = vmatpush.msrb.mxu1 %v1025_v62  ;;  %2291 = vmatpush.msrb.mxu3 %v1259_v63  ;;  %v4581_v62 = vld [vmem:[%s3192_s15 + $0x400] sm:$0xff]  ;;  %v4584_v63 = vld [vmem:[%s3192_s15 + $0x50] sm:$0xff] }
 0x1d2   : > { %2301 = vmatpush.msra.mxu0 %v1104_v0  ;;  %2328 = vmatpush.msra.mxu2 %v1338_v1  ;;  %v1027_v0 = vunpack.c.l.bf16 %v4570_v51  ;;  %v791_v1 = vunpack.c.l.bf16 %v4573_v52  ;;  %v1001_v8 = vunpack.c.l.bf16 %v4581_v62  ;;  %v765_v9 = vunpack.c.l.bf16 %v4584_v63 }
 0x1d3   : > { %2265 = vmatpush.msrb.mxu1 %v999_v4  ;;  %2292 = vmatpush.msrb.mxu3 %v1233_v5  ;;  %v1106_v4 = vunpack.c.h.bf16 %v4537_v29  ;;  %v870_v5 = vunpack.c.h.bf16 %v4532_v26  ;;  %v4618_v29 = vld [vmem:[%s3192_s15 + $0x948] sm:$0xff] }
 0x1d4   : > { %2302 = vmatpush.msra.mxu0 %v1078_v6  ;;  %2329 = vmatpush.msra.mxu2 %v1312_v7  ;;  %v4594_v6 = vld [vmem:[%s3192_s15 + $0x398] sm:$0xff]  ;;  %v1857_v7 = vadd.f32 %v1856_v38, %v1837_v54  ;;  %v871_v54 = vunpack.c.l.bf16 %v4638_v46 }
 0x1d5   : > { %2266 = vmatpush.msrb.mxu1 %v973_v10  ;;  %2293 = vmatpush.msrb.mxu3 %v1207_v11  ;;  %v4599_v10 = vld [vmem:[%s3192_s15 + $0xa18] sm:$0xff]  ;;  %v1797_v11 = vadd.f32 %v1796_v42, %v1411_v57  ;;  %v975_v18 = vunpack.c.l.bf16 %v4594_v6  ;;  %v1002_v42 = vunpack.c.h.bf16 %v4581_v62 }
 0x1d6   : > { %2303 = vmatpush.msra.mxu0 %v1052_v58  ;;  %2330 = vmatpush.msra.mxu2 %v1286_v12  ;;  %v1896_v58 = vpop.f32.mrf.mxu1  ;;  %v1080_v12 = vunpack.c.h.bf16 %v4552_v37  ;;  %v2531_v26 = vrot.slane %v1857_v7, 6  ;;  %v792_v37 = vunpack.c.h.bf16 %v4573_v52  ;;  %v4650_v52 = vld [vmem:[%s3192_s15 + $0x190] sm:$0xff] }
 0x1d7   : > { %2267 = vmatpush.msrb.mxu1 %v947_v16  ;;  %2294 = vmatpush.msrb.mxu3 %v1181_v17  ;;  %v4604_v16 = vld [vmem:[%s3192_s15 + $0x330] sm:$0xff]  ;;  %v845_v62 = vunpack.c.l.bf16 %v4650_v52 }
 0x1d8   : > { %2304 = vmatpush.msra.mxu0 %v1026_v19  ;;  %2331 = vmatpush.msra.mxu2 %v1260_v20  ;;  %v4608_v19 = vld [vmem:[%s3192_s15 + $0x9b0] sm:$0xff] }
 0x1d9   : > { %2734 = vmatmul.msk.f32.vlgmr.msrb.gmra.mxu3 %vm1455_vm3, %v3328_v59  ;;  %2268 = vmatpush.msrb.mxu1 %v921_v22  ;;  %v1391_v22 = vunpack.c.l.bf16 %v4599_v10  ;;  %v1365_v33 = vunpack.c.l.bf16 %v4608_v19  ;;  %v1366_v57 = vunpack.c.h.bf16 %v4608_v19  ;;  %v846_v19 = vunpack.c.h.bf16 %v4650_v52  ;;  %v666_v52 = vld [vmem:[%s3192_s15 + $0x7b0] sm:$0xff] }
 0x1da   : > { %2339 = vmatpush.msra.mxu3 %v1157_v24  ;;  %2305 = vmatpush.msra.mxu0 %v1000_v25  ;;  %v4613_v25 = vld [vmem:[%s3192_s15 + $0x2c8] sm:$0xff] }
 0x1db   : > { %2332 = vmatpush.msra.mxu2 %v1234_v27  ;;  %2269 = vmatpush.msrb.mxu1 %v895_v28  ;;  %v818_v27 = vunpack.c.h.bf16 %v4563_v47  ;;  %v949_v28 = vunpack.c.l.bf16 %v4604_v16  ;;  %v923_v39 = vunpack.c.l.bf16 %v4613_v25  ;;  %v4641_v47 = vld [vmem:[%s3192_s15 + $0x878] sm:$0xff] }
 0x1dc   : > { %2340 = vmatpush.msra.mxu3 %v1131_v30  ;;  %2306 = vmatpush.msra.mxu0 %v974_v32  ;;  %v1876_v53 = vpop.f32.mrf.mxu3  ;;  %v1817_v32 = vadd.f32 %v4523_v21, %v1797_v11 }
 0x1dd   : > { %2333 = vmatpush.msra.mxu2 %v1208_v35  ;;  %2270 = vmatpush.msrb.mxu1 %v869_v36  ;;  %v1877_v2 = vadd.f32 %v1876_v53, %v1413_v48  ;;  %v1936_v24 = vpop.f32.mrf.mxu0  ;;  %v1028_v35 = vunpack.c.h.bf16 %v4570_v51  ;;  %v4624_v36 = vld [vmem:[%s3192_s15 + $0x260] sm:$0xff]  ;;  %v1392_v51 = vunpack.c.h.bf16 %v4599_v10  ;;  %v4653_v53 = vld [vmem:[%s3192_s15 + $0x810] sm:$0xff] }
 0x1de   : > { %2341 = vmatpush.msra.mxu3 %v1105_v40  ;;  %2307 = vmatpush.msra.mxu0 %v948_v41  ;;  %v4630_v40 = vld [vmem:[%s3192_s15 + $0x8e0] sm:$0xff]  ;;  %v1339_v41 = vunpack.c.l.bf16 %v4618_v29  ;;  %v2552_v43 = vsel %vm345_vm0, %v1817_v32, %v2531_v26 }
 0x1df   : > { %2334 = vmatpush.msra.mxu2 %v1182_v44  ;;  %2271 = vmatpush.msrb.mxu1 %v843_v45  ;;  %v1897_v20 = vadd.f32 %v1896_v58, %v1877_v2  ;;  %v766_v44 = vunpack.c.h.bf16 %v4584_v63  ;;  %v897_v45 = vunpack.c.l.bf16 %v4624_v36  ;;  %v1313_v48 = vunpack.c.l.bf16 %v4630_v40  ;;  %v4671_v2 = vld [vmem:[%s3192_s15 + $0xc0] sm:$0xff] }
 0x1e0   : > { %2735 = vmatmul.msk.f32.vlgmr.msra.gmra.mxu2 %vm1455_vm3, %v3328_v59  ;;  %2342 = vmatpush.msra.mxu3 %v1079_v31  ;;  %v1261_v63 = vunpack.c.l.bf16 %v4653_v53  ;;  %v1314_v7 = vunpack.c.h.bf16 %v4630_v40  ;;  %v793_v10 = vunpack.c.l.bf16 %v4671_v2  ;;  %v872_v58 = vunpack.c.h.bf16 %v4638_v46  ;;  %v562_v46 = vld [vmem:[%s3192_s15 + $0x470] sm:$0xff] }
 0x1e1   : > { %2379 = vmatpush.msrb.mxu2 %v1158_v49  ;;  %2308 = vmatpush.msra.mxu0 %v922_v50  ;;  %v2532_v38 = vrot.slane %v1897_v20, 4  ;;  %v976_v50 = vunpack.c.h.bf16 %v4594_v6  ;;  %v898_v6 = vunpack.c.h.bf16 %v4624_v36  ;;  %v1262_v20 = vunpack.c.h.bf16 %v4653_v53 }
 0x1e2   : > { %2343 = vmatpush.msra.mxu3 %v1053_v55  ;;  %2272 = vmatpush.msrb.mxu1 %v817_v56  ;;  %v1287_v55 = vunpack.c.l.bf16 %v4641_v47  ;;  %v950_v56 = vunpack.c.h.bf16 %v4604_v16  ;;  %v794_v32 = vunpack.c.h.bf16 %v4671_v2  ;;  %v1029_v53 = vunpack.c.l.bf16 %v562_v46  ;;  %v640_v2 = vld [vmem:[%s3192_s15 + $0x6e0] sm:$0xff] }
 0x1e3   : > { %2380 = vmatpush.msrb.mxu2 %v1132_v60  ;;  %2309 = vmatpush.msra.mxu0 %v896_v61  ;;  %v1916_v17 = vpop.f32.mrf.mxu2  ;;  %v4660_v60 = vld [vmem:[%s3192_s15 + $0x128] sm:$0xff] }
 0x1e4   : > { %2344 = vmatpush.msra.mxu3 %v1027_v0  ;;  %2273 = vmatpush.msrb.mxu1 %v791_v1  ;;  %v1917_v13 = vadd.f32 %v1916_v17, %v1414_v3  ;;  %v4663_v61 = vld [vmem:[%s3192_s15 + $0x7a8] sm:$0xff]  ;;  %v924_v0 = vunpack.c.h.bf16 %v4613_v25  ;;  %v1340_v1 = vunpack.c.h.bf16 %v4618_v29  ;;  %v4674_v3 = vld [vmem:[%s3192_s15 + $0x740] sm:$0xff]  ;;  %v4693_v17 = vld [vmem:[%s3192_s15 + $0x678] sm:$0xff]  ;;  %v820_v25 = vunpack.c.h.bf16 %v4660_v60 }
 0x1e5   : > { %2381 = vmatpush.msrb.mxu2 %v1106_v4  ;;  %2310 = vmatpush.msra.mxu0 %v870_v5  ;;  %v819_v4 = vunpack.c.l.bf16 %v4660_v60  ;;  %v1235_v5 = vunpack.c.l.bf16 %v4663_v61  ;;  %v1209_v11 = vunpack.c.l.bf16 %v4674_v3  ;;  %v1236_v26 = vunpack.c.h.bf16 %v4663_v61  ;;  %v653_v60 = vld [vmem:[%s3192_s15 + $0x748] sm:$0xff] }
 0x1e6   : > { %2345 = vmatpush.msra.mxu3 %v1001_v8  ;;  %2274 = vmatpush.msrb.mxu1 %v765_v9  ;;  %v1937_v30 = vadd.f32 %v1936_v24, %v1917_v13  ;;  %v4681_v8 = vld [vmem:[%s3192_s15 + $0x58] sm:$0xff]  ;;  %v4701_v13 = vld [vmem:[%s3192_s15 + $0x610] sm:$0xff] }
 0x1e7   : > { %2382 = vmatpush.msrb.mxu2 %v1080_v12  ;;  %2311 = vmatpush.msra.mxu0 %v844_v15  ;;  %v4684_v9 = vld [vmem:[%s3192_s15 + $0x6d8] sm:$0xff]  ;;  %v1288_v12 = vunpack.c.h.bf16 %v4641_v47  ;;  %v767_v15 = vunpack.c.l.bf16 %v4681_v8  ;;  %v1133_v29 = vunpack.c.l.bf16 %v4701_v13 }
 0x1e8   : > { %2275 = vmatmul.f32.vlgmr.msrb.gmra.mxu1 %v3358_v14  ;;  %2346 = vmatpush.msra.mxu3 %v975_v18  ;;  %v2533_v21 = vrot.slane %v1937_v30, 2  ;;  %v1183_v16 = vunpack.c.l.bf16 %v4684_v9  ;;  %v4696_v18 = vld [vmem:[%s3192_s15 + $0xa20] sm:$0xff]  ;;  %v1184_v40 = vunpack.c.h.bf16 %v4684_v9  ;;  %v679_v47 = vld [vmem:[%s3192_s15 + $0x818] sm:$0xff]  ;;  %v1185_v9 = vunpack.c.l.bf16 %v640_v2 }
 0x1e9   : > { %2366 = vmatpush.msra.mxu1 %v1391_v22  ;;  %2383 = vmatpush.msrb.mxu2 %v1054_v23  ;;  %v4704_v22 = vld [vmem:[%s3192_s15 + $0x9b8] sm:$0xff]  ;;  %v1159_v23 = vunpack.c.l.bf16 %v4693_v17  ;;  %v1393_v24 = vunpack.c.l.bf16 %v4696_v18 }
 0x1ea   : > { %2312 = vmatpush.msra.mxu0 %v818_v27  ;;  %2347 = vmatpush.msra.mxu3 %v949_v28  ;;  %v2553_v31 = vsel %vm2545_vm5, %v2532_v38, %v2533_v21  ;;  %v4711_v27 = vld [vmem:[%s3192_s15 + $0x5a8] sm:$0xff]  ;;  %v4714_v28 = vld [vmem:[%s3192_s15 + $0x950] sm:$0xff]  ;;  %v1367_v30 = vunpack.c.l.bf16 %v4704_v22  ;;  %v4734_v21 = vld [vmem:[%s3192_s15 + $0x4d8] sm:$0xff] }
 0x1eb   : > { %2367 = vmatpush.msra.mxu1 %v1365_v33  ;;  %2384 = vmatpush.msrb.mxu2 %v1028_v35  ;;  %v2554_v49 = vsel %vm2547_vm6, %v2552_v43, %v2553_v31  ;;  %v1210_v33 = vunpack.c.h.bf16 %v4674_v3  ;;  %v1107_v35 = vunpack.c.l.bf16 %v4711_v27  ;;  %v1341_v36 = vunpack.c.l.bf16 %v4714_v28  ;;  %v4729_v38 = vld [vmem:[%s3192_s15 + $0x8e8] sm:$0xff] }
 0x1ec   : > { %2313 = vmatpush.msra.mxu0 %v792_v37  ;;  %2348 = vmatpush.msra.mxu3 %v923_v39  ;;  %2574 = vst [vmem:[%s4123_s18 + $0x10] sm:$0xff] %v2554_v49  ;;  %v4726_v37 = vld [vmem:[%s3192_s15 + $0x540] sm:$0xff]  ;;  %v768_v39 = vunpack.c.h.bf16 %v4681_v8  ;;  %v1315_v43 = vunpack.c.l.bf16 %v4729_v38  ;;  %v1055_v31 = vunpack.c.l.bf16 %v4734_v21  ;;  %v1134_v49 = vunpack.c.h.bf16 %v4701_v13 }
 0x1ed   : > { %2368 = vmatpush.msra.mxu1 %v1339_v41  ;;  %2385 = vmatpush.msrb.mxu2 %v1002_v42  ;;  %v4737_v41 = vld [vmem:[%s3192_s15 + $0x880] sm:$0xff]  ;;  %v1081_v42 = vunpack.c.l.bf16 %v4726_v37  ;;  %v1212_v13 = vunpack.c.h.bf16 %v653_v60 }
 0x1ee   : > { %2314 = vmatpush.msra.mxu0 %v766_v44  ;;  %2349 = vmatpush.msra.mxu3 %v897_v45  ;;  %v1160_v44 = vunpack.c.h.bf16 %v4693_v17  ;;  %v1394_v45 = vunpack.c.h.bf16 %v4696_v18  ;;  %v1238_v17 = vunpack.c.h.bf16 %v666_v52  ;;  %v484_v18 = vld [vmem:[%s3192_s15 + $0x200] sm:$0xff] }
 0x1ef   : > { %2315 = vmatmul.f32.vlgmr.msra.gmra.mxu0 %v3358_v14  ;;  %2369 = vmatpush.msra.mxu1 %v1313_v48  ;;  %v1289_v48 = vunpack.c.l.bf16 %v4737_v41 }
 0x1f0   : > { %2386 = vmatpush.msrb.mxu2 %v976_v50  ;;  %2406 = vmatpush.msrb.mxu0 %v1392_v51  ;;  %v1368_v50 = vunpack.c.h.bf16 %v4704_v22  ;;  %v549_v51 = vld [vmem:[%s3192_s15 + $0x408] sm:$0xff]  ;;  %v471_v22 = vld [vmem:[%s3192_s15 + $0x198] sm:$0xff] }
 0x1f1   : > { %2350 = vmatpush.msra.mxu3 %v871_v54  ;;  %2370 = vmatpush.msra.mxu1 %v1287_v55  ;;  %v1263_v54 = vunpack.c.l.bf16 %v679_v47  ;;  %v1108_v55 = vunpack.c.h.bf16 %v4711_v27  ;;  %v1003_v61 = vunpack.c.l.bf16 %v549_v51  ;;  %v1186_v27 = vunpack.c.h.bf16 %v640_v2  ;;  %v1397_v2 = vld [vmem:[%s4018_s24 + $0x10] sm:$0xff] }
 0x1f2   : > { %2387 = vmatpush.msrb.mxu2 %v950_v56  ;;  %2407 = vmatpush.msrb.mxu0 %v1366_v57  ;;  %v1342_v56 = vunpack.c.h.bf16 %v4714_v28  ;;  %v536_v57 = vld [vmem:[%s3192_s15 + $0x3a0] sm:$0xff]  ;;  %v458_v28 = vld [vmem:[%s3192_s15 + $0x130] sm:$0xff] }
 0x1f3   : > { %2351 = vmatpush.msra.mxu3 %v845_v62  ;;  %2371 = vmatpush.msra.mxu1 %v1261_v63  ;;  %v1237_v62 = vunpack.c.l.bf16 %v666_v52  ;;  %v1082_v63 = vunpack.c.h.bf16 %v4726_v37  ;;  %v977_v3 = vunpack.c.l.bf16 %v536_v57  ;;  %v821_v37 = vunpack.c.l.bf16 %v458_v28 }
 0x1f4   : > { %2388 = vmatpush.msrb.mxu2 %v924_v0  ;;  %2408 = vmatpush.msrb.mxu0 %v1340_v1  ;;  %v1316_v0 = vunpack.c.h.bf16 %v4729_v38  ;;  %v523_v1 = vld [vmem:[%s3192_s15 + $0x338] sm:$0xff] }
 0x1f5   : > { %2352 = vmatpush.msra.mxu3 %v819_v4  ;;  %2372 = vmatpush.msra.mxu1 %v1235_v5  ;;  %v1211_v4 = vunpack.c.l.bf16 %v653_v60  ;;  %v1056_v5 = vunpack.c.h.bf16 %v4734_v21  ;;  %v951_v8 = vunpack.c.l.bf16 %v523_v1  ;;  %v432_v21 = vld [vmem:[%s3192_s15 + $0x60] sm:$0xff] }
 0x1f6   : > { %2389 = vmatpush.msrb.mxu2 %v898_v6  ;;  %2409 = vmatpush.msrb.mxu0 %v1314_v7  ;;  %v1290_v6 = vunpack.c.h.bf16 %v4737_v41  ;;  %v510_v7 = vld [vmem:[%s3192_s15 + $0x2d0] sm:$0xff]  ;;  %v770_v60 = vunpack.c.h.bf16 %v432_v21 }
 0x1f7   : > { %2353 = vmatpush.msra.mxu3 %v793_v10  ;;  %2373 = vmatpush.msra.mxu1 %v1209_v11  ;;  %v1030_v10 = vunpack.c.h.bf16 %v562_v46  ;;  %v1264_v11 = vunpack.c.h.bf16 %v679_v47  ;;  %v769_v46 = vunpack.c.l.bf16 %v432_v21 }
 0x1f8   : > { %2390 = vmatpush.msrb.mxu2 %v872_v58  ;;  %2410 = vmatpush.msrb.mxu0 %v1288_v12  ;;  %v497_v58 = vld [vmem:[%s3192_s15 + $0x268] sm:$0xff]  ;;  %v4766_v12 = vpop.f32.mrf.mxu3 }
 0x1f9   : > { %2354 = vmatpush.msra.mxu3 %v767_v15  ;;  %2374 = vmatpush.msra.mxu1 %v1183_v16  ;;  %v925_v15 = vunpack.c.l.bf16 %v510_v7  ;;  %v1004_v16 = vunpack.c.h.bf16 %v549_v51 }
 0x1fa   : > { %2391 = vmatpush.msrb.mxu2 %v846_v19  ;;  %2411 = vmatpush.msrb.mxu0 %v1262_v20  ;;  %v899_v19 = vunpack.c.l.bf16 %v497_v58  ;;  %v978_v20 = vunpack.c.h.bf16 %v536_v57 }
 0x1fb   : > { %2355 = vmatmul.f32.vlgmr.msra.gmra.mxu3 %v3358_v14  ;;  %2736 = vmatmul.msk.f32.vlgmr.msra.gmra.mxu1 %vm1455_vm3, %v3328_v59 }
 0x1fc   : > { %2419 = vmatpush.msrb.mxu1 %v1159_v23  ;;  %2446 = vmatpush.msrb.mxu3 %v1393_v24  ;;  %v873_v23 = vunpack.c.l.bf16 %v484_v18  ;;  %v2016_v24 = vpop.f32.mrf.mxu2 }
 0x1fd   : > { %2392 = vmatpush.msrb.mxu2 %v820_v25  ;;  %2412 = vmatpush.msrb.mxu0 %v1236_v26  ;;  %v1416_v25 = vperm.slane %v4545_v34, 5  ;;  %v952_v26 = vunpack.c.h.bf16 %v523_v1 }
 0x1fe   : > { %2420 = vmatpush.msrb.mxu1 %v1133_v29  ;;  %2447 = vmatpush.msrb.mxu3 %v1367_v30  ;;  %v1956_v29 = vpop.f32.mrf.mxu1 }
 0x1ff   : > { %2393 = vmatpush.msrb.mxu2 %v794_v32  ;;  %2413 = vmatpush.msrb.mxu0 %v1210_v33  ;;  %v847_v32 = vunpack.c.l.bf16 %v471_v22  ;;  %v926_v33 = vunpack.c.h.bf16 %v510_v7  ;;  %v1421_v7 = vperm.slane %v1397_v2, 2 }
 0x200   : > { %2421 = vmatpush.msrb.mxu1 %v1107_v35  ;;  %2448 = vmatpush.msrb.mxu3 %v1341_v36  ;;  %v1996_v30 = vpop.f32.mrf.mxu0  ;;  %v445_v35 = vld [vmem:[%s3192_s15 + $0xc8] sm:$0xff]  ;;  %v1417_v36 = vperm.slane %v4545_v34, 6 }
 0x201   : > { %2394 = vmatpush.msrb.mxu2 %v768_v39  ;;  %2414 = vmatpush.msrb.mxu0 %v1184_v40  ;;  %v1997_v39 = vadd.f32 %v1996_v30, %v1416_v25  ;;  %v900_v40 = vunpack.c.h.bf16 %v497_v58  ;;  %v795_v41 = vunpack.c.l.bf16 %v445_v35  ;;  %v1422_v58 = vperm.slane %v1397_v2, 3 }
 0x202   : > { %2395 = vmatmul.f32.vlgmr.msrb.gmra.mxu2 %v3358_v14  ;;  %2737 = vmatmul.msk.f32.vlgmr.msrb.gmra.mxu0 %vm1455_vm3, %v3328_v59  ;;  %v1424_v30 = vperm.slane %v1397_v2, 5 }
 0x203   : > { %2422 = vmatpush.msrb.mxu1 %v1081_v42  ;;  %2449 = vmatpush.msrb.mxu3 %v1315_v43  ;;  %v1415_v42 = vperm.slane %v4545_v34, 4  ;;  %v874_v43 = vunpack.c.h.bf16 %v484_v18  ;;  %v2017_v47 = vadd.f32 %v2016_v24, %v1997_v39 }
 0x204   : > { %2459 = vmatpush.msra.mxu0 %v1160_v44  ;;  %2486 = vmatpush.msra.mxu2 %v1394_v45  ;;  %v1418_v45 = vperm.slane %v4545_v34, 7  ;;  %v796_v34 = vunpack.c.h.bf16 %v445_v35  ;;  %v1425_v35 = vperm.slane %v1397_v2, 6 }
 0x205   : > { %2423 = vmatpush.msrb.mxu1 %v1055_v31  ;;  %2450 = vmatpush.msrb.mxu3 %v1289_v48  ;;  %v848_v31 = vunpack.c.h.bf16 %v471_v22 }
 0x206   : > { %2460 = vmatpush.msra.mxu0 %v1134_v49  ;;  %2487 = vmatpush.msra.mxu2 %v1368_v50  ;;  %v1957_v50 = vadd.f32 %v1956_v29, %v1415_v42 }
 0x207   : > { %2424 = vmatpush.msrb.mxu1 %v1029_v53  ;;  %2451 = vmatpush.msrb.mxu3 %v1263_v54  ;;  %v2534_v54 = vrot.slane %v2017_v47, 6 }
 0x208   : > { %2461 = vmatpush.msra.mxu0 %v1108_v55  ;;  %2488 = vmatpush.msra.mxu2 %v1342_v56  ;;  %v1977_v56 = vadd.f32 %v4766_v12, %v1957_v50 }
 0x209   : > { %2425 = vmatpush.msrb.mxu1 %v1003_v61  ;;  %2452 = vmatpush.msrb.mxu3 %v1237_v62 }
 0x20a   : > { %2462 = vmatpush.msra.mxu0 %v1082_v63  ;;  %2489 = vmatpush.msra.mxu2 %v1316_v0  ;;  %v2555_v62 = vsel %vm345_vm0, %v1977_v56, %v2534_v54 }
 0x20b   : > { %2426 = vmatpush.msrb.mxu1 %v977_v3  ;;  %2453 = vmatpush.msrb.mxu3 %v1211_v4  ;;  %v1420_v4 = vperm.slane %v1397_v2, 1 }
 0x20c   : > { %2463 = vmatpush.msra.mxu0 %v1056_v5  ;;  %2490 = vmatpush.msra.mxu2 %v1290_v6  ;;  %v2056_v48 = vpop.f32.mrf.mxu1 }
 0x20d   : > { %2427 = vmatpush.msrb.mxu1 %v951_v8  ;;  %2454 = vmatpush.msrb.mxu3 %v1185_v9 }
 0x20e   : > { %2464 = vmatpush.msra.mxu0 %v1030_v10  ;;  %2491 = vmatpush.msra.mxu2 %v1264_v11  ;;  %v1419_v10 = vperm.slane %v1397_v2, 0 }
 0x20f   : > { %2738 = vmatmul.msk.f32.vlgmr.msrb.gmra.mxu3 %vm1455_vm3, %v3328_v59  ;;  %2428 = vmatpush.msrb.mxu1 %v925_v15 }
 0x210   : > { %2465 = vmatpush.msra.mxu0 %v1004_v16  ;;  %2492 = vmatpush.msra.mxu2 %v1238_v17 }
 0x211   : > { %2429 = vmatpush.msrb.mxu1 %v899_v19 }
 0x212   : > { %2466 = vmatpush.msra.mxu0 %v978_v20  ;;  %2493 = vmatpush.msra.mxu2 %v1212_v13  ;;  %v2036_v38 = vpop.f32.mrf.mxu3 }
 0x213   : > { %2430 = vmatpush.msrb.mxu1 %v873_v23  ;;  %v2037_v44 = vadd.f32 %v2036_v38, %v1417_v36  ;;  %v2096_v53 = vpop.f32.mrf.mxu0  ;;  %v1423_v38 = vperm.slane %v1397_v2, 4 }
 0x214   : > { %2467 = vmatpush.msra.mxu0 %v952_v26  ;;  %2494 = vmatpush.msra.mxu2 %v1186_v27 }
 0x215   : > { %2739 = vmatmul.msk.f32.vlgmr.msra.gmra.mxu2 %vm1455_vm3, %v3328_v59  ;;  %2431 = vmatpush.msrb.mxu1 %v847_v32  ;;  %v822_v59 = vunpack.c.h.bf16 %v458_v28  ;;  %v2057_v51 = vadd.f32 %v2056_v48, %v2037_v44 }
 0x216   : > { %2468 = vmatpush.msra.mxu0 %v926_v33 }
 0x217   : > { %2432 = vmatpush.msrb.mxu1 %v821_v37  ;;  %v2535_v57 = vrot.slane %v2057_v51, 4 }
 0x218   : > { %2469 = vmatpush.msra.mxu0 %v900_v40  ;;  %v1426_v40 = vperm.slane %v1397_v2, 7 }
 0x219   : > { %2433 = vmatpush.msrb.mxu1 %v795_v41  ;;  %v2076_v49 = vpop.f32.mrf.mxu2 }
 0x21a   : > { %2470 = vmatpush.msra.mxu0 %v874_v43  ;;  %v2077_v52 = vadd.f32 %v2076_v49, %v1418_v45 }
 0x21b   : > { %2434 = vmatpush.msrb.mxu1 %v769_v46 }
 0x21c   : > { %2471 = vmatpush.msra.mxu0 %v848_v31  ;;  %2435 = vmatmul.f32.vlgmr.msrb.gmra.mxu1 %v3358_v14  ;;  %v2097_v55 = vadd.f32 %v2096_v53, %v2077_v52  ;;  %v1398_v53 = vld [vmem:[%s4018_s24 + $0x18] sm:$0x3] }
 0x21d   : > { %v1427_v54 = vperm.slane %v1398_v53, 0 }
 0x21e   : > { %2472 = vmatpush.msra.mxu0 %v822_v59  ;;  %v2536_v61 = vrot.slane %v2097_v55, 2 }
 0x220   : > { %2473 = vmatpush.msra.mxu0 %v796_v34  ;;  %v2556_v63 = vsel %vm2545_vm5, %v2535_v57, %v2536_v61  ;;  %v1428_v34 = vperm.slane %v1398_v53, 1 }
 0x221   : > { %v2557_v0 = vsel %vm2547_vm6, %v2555_v62, %v2556_v63 }
 0x222   : > { %2474 = vmatpush.msra.mxu0 %v770_v60  ;;  %2575 = vst [vmem:[%s4123_s18 + $0x18] sm:$0xff] %v2557_v0 }
 0x223   : > { %2475 = vmatmul.f32.vlgmr.msra.gmra.mxu0 %v3358_v14 }
 0x226   : > { %v2136_v1 = vpop.f32.mrf.mxu3 }
 0x22d   : > { %v2176_v3 = vpop.f32.mrf.mxu2 }
 0x22f   : > { %v2116_v5 = vpop.f32.mrf.mxu1 }
 0x230   : > { %v2117_v17 = vadd.f32 %v2116_v5, %v1419_v10 }
 0x232   : > { %v2137_v22 = vadd.f32 %v2136_v1, %v2117_v17 }
 0x236   : > { %v2156_v6 = vpop.f32.mrf.mxu0 }
 0x237   : > { %v2157_v9 = vadd.f32 %v2156_v6, %v1420_v4 }
 0x239   : > { %v2177_v12 = vadd.f32 %v2176_v3, %v2157_v9 }
 0x23b   : > { %v2537_v20 = vrot.slane %v2177_v12, 6 }
 0x23d   : > { %v2558_v25 = vsel %vm345_vm0, %v2137_v22, %v2537_v20 }
 0x242   : > { %v2216_v15 = vpop.f32.mrf.mxu1 }
 0x248   : > { %v2196_v8 = vpop.f32.mrf.mxu3 }
 0x249   : > { %v2197_v11 = vadd.f32 %v2196_v8, %v1421_v7  ;;  %v2256_v14 = vpop.f32.mrf.mxu0 }
 0x24b   : > { %v2217_v18 = vadd.f32 %v2216_v15, %v2197_v11 }
 0x24d   : > { %v2538_v23 = vrot.slane %v2217_v18, 4 }
 0x24f   : > { %v2236_v16 = vpop.f32.mrf.mxu2 }
 0x250   : > { %v2237_v19 = vadd.f32 %v2236_v16, %v1422_v58 }
 0x252   : > { %v2257_v13 = vadd.f32 %v2256_v14, %v2237_v19 }
 0x254   : > { %v2539_v24 = vrot.slane %v2257_v13, 2 }
 0x256   : > { %v2559_v26 = vsel %vm2545_vm5, %v2538_v23, %v2539_v24 }
 0x257   : > { %v2560_v27 = vsel %vm2547_vm6, %v2558_v25, %v2559_v26 }
 0x258   : > { %2576 = vst [vmem:[%s4123_s18 + $0x20] sm:$0xff] %v2560_v27 }
 0x25c   : > { %v2296_v28 = vpop.f32.mrf.mxu3 }
 0x263   : > { %v2336_v29 = vpop.f32.mrf.mxu2 }
 0x265   : > { %v2276_v32 = vpop.f32.mrf.mxu1 }
 0x266   : > { %v2277_v43 = vadd.f32 %v2276_v32, %v1423_v38 }
 0x268   : > { %v2297_v48 = vadd.f32 %v2296_v28, %v2277_v43 }
 0x26c   : > { %v2316_v33 = vpop.f32.mrf.mxu0 }
 0x26d   : > { %v2317_v37 = vadd.f32 %v2316_v33, %v1424_v30 }
 0x26f   : > { %v2337_v21 = vadd.f32 %v2336_v29, %v2317_v37 }
 0x271   : > { %v2540_v47 = vrot.slane %v2337_v21, 6 }
 0x273   : > { %v2561_v59 = vsel %vm345_vm0, %v2297_v48, %v2540_v47 }
 0x278   : > { %v2376_v41 = vpop.f32.mrf.mxu1 }
 0x27e   : > { %v2356_v36 = vpop.f32.mrf.mxu3 }
 0x27f   : > { %v2357_v39 = vadd.f32 %v2356_v36, %v1425_v35  ;;  %v2416_v46 = vpop.f32.mrf.mxu0 }
 0x281   : > { %v2377_v44 = vadd.f32 %v2376_v41, %v2357_v39 }
 0x283   : > { %v2541_v49 = vrot.slane %v2377_v44, 4 }
 0x285   : > { %v2396_v42 = vpop.f32.mrf.mxu2 }
 0x286   : > { %v2397_v45 = vadd.f32 %v2396_v42, %v1426_v40 }
 0x288   : > { %v2417_v31 = vadd.f32 %v2416_v46, %v2397_v45 }
 0x28a   : > { %v2542_v50 = vrot.slane %v2417_v31, 2 }
 0x28c   : > { %v2562_v51 = vsel %vm2545_vm5, %v2541_v49, %v2542_v50 }
 0x28d   : > { %v2563_v52 = vsel %vm2547_vm6, %v2561_v59, %v2562_v51 }
 0x28e   : > { %2577 = vst [vmem:[%s4123_s18 + $0x28] sm:$0xff] %v2563_v52 }
 0x292   : > { %v2456_v63 = vpop.f32.mrf.mxu3 }
 0x298   : > { %v2496_v61 = vpop.f32.mrf.mxu2 }
 0x299   : > { %v2436_v55 = vpop.f32.mrf.mxu1 }
 0x29a   : > { %v2437_v57 = vadd.f32 %v2436_v55, %v1427_v54 }
 0x29c   : > { %v2457_v0 = vadd.f32 %v2456_v63, %v2437_v57 }
 0x2a0   : > { %v2476_v56 = vpop.f32.mrf.mxu0 }
 0x2a1   : > { %v2477_v60 = vadd.f32 %v2476_v56, %v1428_v34 }
 0x2a3   : > { %v2497_v62 = vadd.f32 %v2496_v61, %v2477_v60 }
 0x2a5   : > { %v2543_v1 = vrot.slane %v2497_v62, 6 }
 0x2a7   : > { %v2564_v2 = vsel %vm345_vm0, %v2457_v0, %v2543_v1 }
 0x2a8   : > { %2578 = vst [vmem:[%s4123_s18 + $0x30] sm:$0xf] %v2564_v2 }
 0x2a9 PF: > { %p17_p4 = scmp.ge.s32.totalorder %s3108_s6, 8   ;;  %s4828_s18 = smov %s3016_s19 }
 0x2aa   : > { %s4829_s19 = smov %s3020_s20  ;;  %s4830_s20 = smov %s3120_s9 }
 0x2ab   : > { %s4831_s21 = smov %s3108_s6  ;;  %19 = sbr.rel (!%p17_p4) target bundleno = 7 (0x7), region = 104 }
 0x2b0   :  { %2601 = vsyncpa [#allocation3], 1 }
 0x2b1   :  { %2603 = vsyncpa [#allocation3 + $0x1], 1 }
 0x2b2   :  { %2604 = vsyncpa [#allocation5], 1 }
 0x2b3   :  { %2605 = vsyncpa [#allocation8], 1 }
 0x2b4   :  { %2607 = vsyncpa [#allocation8 + $0x1], 1 }

</bundles_post_ra>
